<compile_context>
chip_gen: v5e
topology: v5e:2x2
jax: 0.10.0
libtpu: 0.0.40
codegen_flags: <defaults>
</compile_context>

<pallas_src>
import functools
import math

import jax
import jax.numpy as jnp
from jax import lax
from jax.experimental import pallas as pl
from jax.experimental.pallas import tpu as pltpu

D_MODEL = 32
N_HEADS = 4
D_K = D_MODEL // N_HEADS
D_FF = 64
EPS = 1e-6
NEG_INF = -1e9

# Packed-weight slot layout: (12, D_MODEL, D_MODEL)
_SA_BASE, _CA_BASE = 0, 4            # wq, wk, wv, wo at base+0 .. base+3
_FF_W1A, _FF_W1B = 8, 9              # ff.w1[:, :32], ff.w1[:, 32:]
_FF_W2A, _FF_W2B = 10, 11            # ff.w2[:32, :], ff.w2[32:, :]
# Packed-bias row layout: (11, D_MODEL)
_FF_B1A, _FF_B1B, _FF_B2 = 8, 9, 10  # rows 0..7 are the attention biases


# ----------------------------- kernel helpers -----------------------------
def _layernorm(x, alpha, beta):
    # Matches PyTorch LayerNormalization: unbiased std (N-1), scalar affine,
    # eps added to std (not var).  Exact reciprocal here (only three (M,1)
    # tiles per kernel) so the error does not compound across residuals.
    d = x.shape[-1]
    mean = jnp.mean(x, axis=-1, keepdims=True)
    var = jnp.sum((x - mean) ** 2, axis=-1, keepdims=True) * (1.0 / (d - 1))
    return alpha * ((x - mean) / (jnp.sqrt(var) + EPS)) + beta


def _bias_row(b_ref, i):
    return b_ref[i:i + 1, :]                       # (1, D_MODEL), broadcasts


def _mha(q_in, kv_in, masked_tiled, w_ref, b_ref, base, batch, s_q, s_kv):
    """Multi-head attention on batch-folded activations.

    q_in:  (batch*s_q,  D)      kv_in: (batch*s_kv, D)
    masked_tiled: (N_HEADS*batch*s_q, s_kv) bool, True => masked (fill -1e9),
                  compare hoisted & head-replicated by the caller.
    w_ref: (12, D, D) packed weights; b_ref: (11, D) packed biases.
    base = 0 (self-attention) or 4 (cross-attention).
    NOTE: the 1/sqrt(d_k) scale is already folded into wq / bq at pack time.
    """
    wq, wk, wv, wo = (w_ref[base + 0], w_ref[base + 1],
                      w_ref[base + 2], w_ref[base + 3])
    bq, bk, bv, bo = (_bias_row(b_ref, base + 0), _bias_row(b_ref, base + 1),
                      _bias_row(b_ref, base + 2), _bias_row(b_ref, base + 3))

    # Fused full-width projections: (B*S, D) @ (D, D), one MXU pass each.
    q = jnp.dot(q_in, wq, preferred_element_type=jnp.float32) + bq
    k = jnp.dot(kv_in, wk, preferred_element_type=jnp.float32) + bk
    v = jnp.dot(kv_in, wv, preferred_element_type=jnp.float32) + bv

    # q @ k^T without materializing k.T: contract the last dims directly.
    dn = (((1,), (1,)), ((), ()))

    # --- score tiles, sublane-stacked so softmax runs ONCE per MHA ---------
    tiles = []
    for h in range(N_HEADS):                       # static unroll, H = 4
        c0 = h * D_K
        for b in range(batch):                     # static unroll, B = 2
            qbh = q[b * s_q:(b + 1) * s_q, c0:c0 + D_K]        # (s_q,  D_K)
            kbh = k[b * s_kv:(b + 1) * s_kv, c0:c0 + D_K]      # (s_kv, D_K)
            tiles.append(lax.dot_general(qbh, kbh, dn,
                                         preferred_element_type=jnp.float32))
    scores = jnp.concatenate(tiles, axis=0)        # (H*B*s_q, s_kv), sublane concat
    scores = jnp.where(masked_tiled, jnp.float32(NEG_INF), scores)

    # One batched softmax pass (masked_fill -> softmax). Approx reciprocal on
    # the denominator only (EUP slot, essentially free).
    m = jnp.max(scores, axis=-1, keepdims=True)
    e = jnp.exp(scores - m)
    p = e * pl.reciprocal(jnp.sum(e, axis=-1, keepdims=True), approx=True)

    # --- per-head accumulation of the output projection (no lane concat) ---
    out_rows = []
    for b in range(batch):
        acc = None
        for h in range(N_HEADS):
            t = h * batch + b                      # tile ordering: h outer, b inner
            p_bh = p[t * s_q:(t + 1) * s_q, :]                       # (s_q, s_kv)
            vbh = v[b * s_kv:(b + 1) * s_kv, h * D_K:(h + 1) * D_K]  # (s_kv, D_K)
            pv = jnp.dot(p_bh, vbh, preferred_element_type=jnp.float32)
            contrib = jnp.dot(pv, wo[h * D_K:(h + 1) * D_K, :],
                              preferred_element_type=jnp.float32)    # (s_q, D)
            acc = contrib if acc is None else acc + contrib
        out_rows.append(acc + bo)
    return jnp.concatenate(out_rows, axis=0)       # (B*s_q, D), sublane concat


# --------------------------------- kernel ----------------------------------
def decoder_block_kernel(
    batch, s_dec, s_enc,                      # static (bound via functools.partial)
    ln_ref,                                   # SMEM (6,): [a0, b0, a1, b1, a2, b2]
    x_ref, enc_ref, tgt_mask_ref, src_mask_ref,
    w_ref, b_ref,                             # (12, D, D), (11, D)
    out_ref,
):
    # Scalar (SMEM) reads first.
    a0, b0 = ln_ref[0], ln_ref[1]
    a1, b1 = ln_ref[2], ln_ref[3]
    a2, b2 = ln_ref[4], ln_ref[5]

    x = x_ref[...]                            # (B*S_dec, D)
    enc = enc_ref[...]                        # (B*S_enc, D)

    # Hoisted mask compares; head-replicated once per MHA via sublane concat.
    tgt_masked = jnp.concatenate([tgt_mask_ref[...] == 0.0] * N_HEADS, axis=0)
    src_masked = jnp.concatenate([src_mask_ref[...] == 0.0] * N_HEADS, axis=0)

    # TODO(synk): nn.Dropout layers are identity here (eval mode / p = 0).

    # 1) self-attention residual
    n0 = _layernorm(x, a0, b0)
    x = x + _mha(n0, n0, tgt_masked, w_ref, b_ref, _SA_BASE, batch, s_dec, s_dec)

    # 2) cross-attention residual
    n1 = _layernorm(x, a1, b1)
    x = x + _mha(n1, enc, src_masked, w_ref, b_ref, _CA_BASE, batch, s_dec, s_enc)

    # 3) feed-forward residual (w1/w2 split into (32,32) slots at pack time:
    #    relu(n2 @ w1) @ w2 == relu(n2@w1a)@w2a + relu(n2@w1b)@w2b + b2)
    n2 = _layernorm(x, a2, b2)
    h_lo = jnp.maximum(
        jnp.dot(n2, w_ref[_FF_W1A], preferred_element_type=jnp.float32)
        + _bias_row(b_ref, _FF_B1A), 0.0)
    h_hi = jnp.maximum(
        jnp.dot(n2, w_ref[_FF_W1B], preferred_element_type=jnp.float32)
        + _bias_row(b_ref, _FF_B1B), 0.0)
    x = (x
         + jnp.dot(h_lo, w_ref[_FF_W2A], preferred_element_type=jnp.float32)
         + jnp.dot(h_hi, w_ref[_FF_W2B], preferred_element_type=jnp.float32)
         + _bias_row(b_ref, _FF_B2))

    out_ref[...] = x.astype(out_ref.dtype)


# --------------------------------- wrapper ----------------------------------
@jax.jit
def decoder_block(ln_params, x, enc, tgt_mask, src_mask, w_pack, b_pack):
    B, S_dec, D = x.shape
    S_enc = enc.shape[1]
    # Layout plumbing in the wrapper: fold B into the M (sublane) dimension.
    x2 = x.reshape(B * S_dec, D)
    enc2 = enc.reshape(B * S_enc, D)
    tgt_mask2 = tgt_mask.reshape(B * S_dec, S_dec)
    src_mask2 = src_mask.reshape(B * S_dec, S_enc)

    kernel = functools.partial(decoder_block_kernel, B, S_dec, S_enc)

    def _vmem():
        return pl.BlockSpec(memory_space=pltpu.MemorySpace.VMEM)

    in_specs = [pl.BlockSpec(memory_space=pltpu.MemorySpace.SMEM)]  # ln scalars
    in_specs += [_vmem() for _ in range(6)]                         # all other inputs

    out2 = pl.pallas_call(
        kernel,
        out_shape=jax.ShapeDtypeStruct((B * S_dec, D), jnp.float32),
        in_specs=in_specs,
        out_specs=_vmem(),
    )(ln_params, x2, enc2, tgt_mask2, src_mask2, w_pack, b_pack)

    return out2.reshape(B, S_dec, D)


# ---------------------------- parameter init --------------------------------
def _linear_init(key, fan_in, fan_out):
    kw, kb = jax.random.split(key)
    bound = 1.0 / math.sqrt(fan_in)
    w = jax.random.uniform(kw, (fan_in, fan_out), jnp.float32, -bound, bound)
    b = jax.random.uniform(kb, (fan_out,), jnp.float32, -bound, bound)
    return w, b


def init_raw_params(key):
    keys = jax.random.split(key, 4)

    def attn(k):
        k0, k1, k2, k3 = jax.random.split(k, 4)
        wq, bq = _linear_init(k0, D_MODEL, D_MODEL)
        wk, bk = _linear_init(k1, D_MODEL, D_MODEL)
        wv, bv = _linear_init(k2, D_MODEL, D_MODEL)
        wo, bo = _linear_init(k3, D_MODEL, D_MODEL)
        return dict(wq=wq, bq=bq, wk=wk, bk=bk, wv=wv, bv=bv, wo=wo, bo=bo)

    w1, b1 = _linear_init(keys[2], D_MODEL, D_FF)
    w2, b2 = _linear_init(keys[3], D_FF, D_MODEL)
    return dict(sa=attn(keys[0]), ca=attn(keys[1]),
                ff=dict(w1=w1, b1=b1, w2=w2, b2=b2))


def pack_kernel_params(raw):
    """Pack ALL weights into one (12,D,D) buffer and ALL biases into one (11,D).

    Runs once offline: the 1/sqrt(d_k) softmax scale is folded into w_q / b_q,
    and the FFN matrices are split into (D,D) slots so everything rides a
    single weight DMA + a single bias DMA.
    """
    sa, ca, ff = raw['sa'], raw['ca'], raw['ff']
    scale = 1.0 / math.sqrt(D_K)
    w_pack = jnp.stack([
        sa['wq'] * scale, sa['wk'], sa['wv'], sa['wo'],
        ca['wq'] * scale, ca['wk'], ca['wv'], ca['wo'],
        ff['w1'][:, :D_MODEL], ff['w1'][:, D_MODEL:],
        ff['w2'][:D_MODEL, :], ff['w2'][D_MODEL:, :],
    ])                                                        # (12, D, D)
    b_pack = jnp.stack([
        sa['bq'] * scale, sa['bk'], sa['bv'], sa['bo'],
        ca['bq'] * scale, ca['bk'], ca['bv'], ca['bo'],
        ff['b1'][:D_MODEL], ff['b1'][D_MODEL:], ff['b2'],
    ])                                                        # (11, D)
    return w_pack, b_pack


# ---------------------------- pure-JAX reference ----------------------------
def _ref_layernorm(x, alpha, beta):
    d = x.shape[-1]
    mean = jnp.mean(x, -1, keepdims=True)
    var = jnp.sum((x - mean) ** 2, -1, keepdims=True) / (d - 1)
    return alpha * (x - mean) / (jnp.sqrt(var) + EPS) + beta


def _ref_mha(q_in, kv_in, mask, p):
    B, Sq, D = q_in.shape
    Sk = kv_in.shape[1]
    q = (q_in @ p['wq'] + p['bq']).reshape(B, Sq, N_HEADS, D_K).transpose(0, 2, 1, 3)
    k = (kv_in @ p['wk'] + p['bk']).reshape(B, Sk, N_HEADS, D_K).transpose(0, 2, 1, 3)
    v = (kv_in @ p['wv'] + p['bv']).reshape(B, Sk, N_HEADS, D_K).transpose(0, 2, 1, 3)
    scores = q @ jnp.swapaxes(k, -2, -1) / math.sqrt(D_K)
    scores = jnp.where(mask[:, None] == 0.0, jnp.float32(NEG_INF), scores)
    attn = jax.nn.softmax(scores, axis=-1)
    o = (attn @ v).transpose(0, 2, 1, 3).reshape(B, Sq, D)
    return o @ p['wo'] + p['bo']


def ref_decoder(x, enc, tgt_mask, src_mask, raw):
    n = _ref_layernorm(x, 1.0, 0.0)
    x = x + _ref_mha(n, n, tgt_mask, raw['sa'])
    n = _ref_layernorm(x, 1.0, 0.0)
    x = x + _ref_mha(n, enc, src_mask, raw['ca'])
    n = _ref_layernorm(x, 1.0, 0.0)
    h = jax.nn.relu(n @ raw['ff']['w1'] + raw['ff']['b1'])
    return x + h @ raw['ff']['w2'] + raw['ff']['b2']


# ----------------------------------- main ------------------------------------
if __name__ == "__main__":
    key = jax.random.PRNGKey(0)
    k_x, k_enc, k_p = jax.random.split(key, 3)

    B, S_DEC, S_ENC = 2, 8, 8
    x = jax.random.normal(k_x, (B, S_DEC, D_MODEL), jnp.float32)
    enc = jax.random.normal(k_enc, (B, S_ENC, D_MODEL), jnp.float32)

    # causal target mask, all-ones source mask (0.0 => masked)
    tgt_mask = jnp.broadcast_to(
        jnp.tril(jnp.ones((S_DEC, S_DEC), jnp.float32)), (B, S_DEC, S_DEC))
    src_mask = jnp.ones((B, S_DEC, S_ENC), jnp.float32)

    # LayerNormalization params: alpha=1, bias=0 (PyTorch init), one pair per residual
    ln_params = jnp.array([1.0, 0.0, 1.0, 0.0, 1.0, 0.0], jnp.float32)

    raw = init_raw_params(k_p)
    w_pack, b_pack = pack_kernel_params(raw)

    out = decoder_block(ln_params, x, enc, tgt_mask, src_mask, w_pack, b_pack)
    out = jax.block_until_ready(out)

    ref = jax.block_until_ready(ref_decoder(x, enc, tgt_mask, src_mask, raw))
    assert out.shape == (B, S_DEC, D_MODEL)
    max_err = jnp.max(jnp.abs(out - ref))
    # Tolerance: LayerNorm now uses an exact reciprocal; only the softmax
    # denominator uses the EUP approximate reciprocal (pl.reciprocal(approx=True)).
    assert jnp.allclose(out, ref, atol=2e-3, rtol=2e-3), f"max abs err {max_err}"

    print("KERNEL_OK")
</pallas_src>

<mosaic_0001>
module attributes {stable_mosaic.version = 11 : i64} {
  func.func @decoder_block_kernel(%arg0: memref<6xf32, #tpu.memory_space<smem>>, %arg1: memref<16x32xf32, #tpu.memory_space<vmem>>, %arg2: memref<16x32xf32, #tpu.memory_space<vmem>>, %arg3: memref<16x8xf32, #tpu.memory_space<vmem>>, %arg4: memref<16x8xf32, #tpu.memory_space<vmem>>, %arg5: memref<12x32x32xf32, #tpu.memory_space<vmem>>, %arg6: memref<11x32xf32, #tpu.memory_space<vmem>>, %arg7: memref<16x32xf32, #tpu.memory_space<vmem>>) attributes {dimension_semantics = [], scalar_prefetch = 0 : i64, scratch_operands = 0 : i64, tpu.core_type = #tpu.core_type<tc>} {
    %c0 = arith.constant 0 : index
    %0 = memref.load %arg0[%c0] : memref<6xf32, #tpu.memory_space<smem>>
    %c1 = arith.constant 1 : index
    %1 = memref.load %arg0[%c1] : memref<6xf32, #tpu.memory_space<smem>>
    %c2 = arith.constant 2 : index
    %2 = memref.load %arg0[%c2] : memref<6xf32, #tpu.memory_space<smem>>
    %c3 = arith.constant 3 : index
    %3 = memref.load %arg0[%c3] : memref<6xf32, #tpu.memory_space<smem>>
    %c4 = arith.constant 4 : index
    %4 = memref.load %arg0[%c4] : memref<6xf32, #tpu.memory_space<smem>>
    %c5 = arith.constant 5 : index
    %5 = memref.load %arg0[%c5] : memref<6xf32, #tpu.memory_space<smem>>
    %c0_0 = arith.constant 0 : index
    %c0_1 = arith.constant 0 : index
    %6 = vector.load %arg1[%c0_0, %c0_1] : memref<16x32xf32, #tpu.memory_space<vmem>>, vector<16x32xf32>
    %c0_2 = arith.constant 0 : index
    %c0_3 = arith.constant 0 : index
    %7 = vector.load %arg2[%c0_2, %c0_3] : memref<16x32xf32, #tpu.memory_space<vmem>>, vector<16x32xf32>
    %c0_4 = arith.constant 0 : index
    %c0_5 = arith.constant 0 : index
    %8 = vector.load %arg3[%c0_4, %c0_5] : memref<16x8xf32, #tpu.memory_space<vmem>>, vector<16x8xf32>
    %cst = arith.constant 0.000000e+00 : f32
    %9 = vector.broadcast %cst : f32 to vector<16x8xf32>
    %10 = arith.cmpf oeq, %8, %9 : vector<16x8xf32>
    %11 = tpu.concatenate %10, %10, %10, %10 in 0 : vector<16x8xi1>, vector<16x8xi1>, vector<16x8xi1>, vector<16x8xi1> -> vector<64x8xi1>
    %c0_6 = arith.constant 0 : index
    %c0_7 = arith.constant 0 : index
    %12 = vector.load %arg4[%c0_6, %c0_7] : memref<16x8xf32, #tpu.memory_space<vmem>>, vector<16x8xf32>
    %cst_8 = arith.constant 0.000000e+00 : f32
    %13 = vector.broadcast %cst_8 : f32 to vector<16x8xf32>
    %14 = arith.cmpf oeq, %12, %13 : vector<16x8xf32>
    %15 = tpu.concatenate %14, %14, %14, %14 in 0 : vector<16x8xi1>, vector<16x8xi1>, vector<16x8xi1>, vector<16x8xi1> -> vector<64x8xi1>
    %cst_9 = arith.constant dense<0.000000e+00> : vector<16xf32>
    %16 = vector.multi_reduction <add>, %6, %cst_9 [1] : vector<16x32xf32> to vector<16xf32>
    %17 = vector.shape_cast %16 : vector<16xf32> to vector<16x1xf32>
    %cst_10 = arith.constant 3.200000e+01 : f32
    %18 = vector.broadcast %cst_10 : f32 to vector<16x1xf32>
    %19 = arith.divf %17, %18 : vector<16x1xf32>
    %20 = vector.broadcast %19 : vector<16x1xf32> to vector<16x32xf32>
    %21 = arith.subf %6, %20 : vector<16x32xf32>
    %22 = arith.mulf %21, %21 : vector<16x32xf32>
    %cst_11 = arith.constant dense<0.000000e+00> : vector<16xf32>
    %23 = vector.multi_reduction <add>, %22, %cst_11 [1] : vector<16x32xf32> to vector<16xf32>
    %24 = vector.shape_cast %23 : vector<16xf32> to vector<16x1xf32>
    %cst_12 = arith.constant 0.0322580636 : f32
    %25 = vector.broadcast %cst_12 : f32 to vector<16x1xf32>
    %26 = arith.mulf %24, %25 : vector<16x1xf32>
    %27 = vector.broadcast %19 : vector<16x1xf32> to vector<16x32xf32>
    %28 = arith.subf %6, %27 : vector<16x32xf32>
    %29 = math.sqrt %26 : vector<16x1xf32>
    %cst_13 = arith.constant 9.99999997E-7 : f32
    %30 = vector.broadcast %cst_13 : f32 to vector<16x1xf32>
    %31 = arith.addf %29, %30 : vector<16x1xf32>
    %32 = vector.broadcast %31 : vector<16x1xf32> to vector<16x32xf32>
    %33 = arith.divf %28, %32 : vector<16x32xf32>
    %34 = vector.broadcast %0 : f32 to vector<16x32xf32>
    %35 = arith.mulf %34, %33 : vector<16x32xf32>
    %36 = vector.broadcast %1 : f32 to vector<16x32xf32>
    %37 = arith.addf %35, %36 : vector<16x32xf32>
    %c0_14 = arith.constant 0 : index
    %c0_15 = arith.constant 0 : index
    %c0_16 = arith.constant 0 : index
    %38 = vector.load %arg5[%c0_14, %c0_15, %c0_16] : memref<12x32x32xf32, #tpu.memory_space<vmem>>, vector<1x32x32xf32>
    %39 = vector.shape_cast %38 : vector<1x32x32xf32> to vector<32x32xf32>
    %c1_17 = arith.constant 1 : index
    %c0_18 = arith.constant 0 : index
    %c0_19 = arith.constant 0 : index
    %40 = vector.load %arg5[%c1_17, %c0_18, %c0_19] : memref<12x32x32xf32, #tpu.memory_space<vmem>>, vector<1x32x32xf32>
    %41 = vector.shape_cast %40 : vector<1x32x32xf32> to vector<32x32xf32>
    %c2_20 = arith.constant 2 : index
    %c0_21 = arith.constant 0 : index
    %c0_22 = arith.constant 0 : index
    %42 = vector.load %arg5[%c2_20, %c0_21, %c0_22] : memref<12x32x32xf32, #tpu.memory_space<vmem>>, vector<1x32x32xf32>
    %43 = vector.shape_cast %42 : vector<1x32x32xf32> to vector<32x32xf32>
    %c3_23 = arith.constant 3 : index
    %c0_24 = arith.constant 0 : index
    %c0_25 = arith.constant 0 : index
    %44 = vector.load %arg5[%c3_23, %c0_24, %c0_25] : memref<12x32x32xf32, #tpu.memory_space<vmem>>, vector<1x32x32xf32>
    %45 = vector.shape_cast %44 : vector<1x32x32xf32> to vector<32x32xf32>
    %c0_26 = arith.constant 0 : index
    %c0_27 = arith.constant 0 : index
    %46 = vector.load %arg6[%c0_26, %c0_27] : memref<11x32xf32, #tpu.memory_space<vmem>>, vector<1x32xf32>
    %c1_28 = arith.constant 1 : index
    %c0_29 = arith.constant 0 : index
    %47 = vector.load %arg6[%c1_28, %c0_29] : memref<11x32xf32, #tpu.memory_space<vmem>>, vector<1x32xf32>
    %c2_30 = arith.constant 2 : index
    %c0_31 = arith.constant 0 : index
    %48 = vector.load %arg6[%c2_30, %c0_31] : memref<11x32xf32, #tpu.memory_space<vmem>>, vector<1x32xf32>
    %c3_32 = arith.constant 3 : index
    %c0_33 = arith.constant 0 : index
    %49 = vector.load %arg6[%c3_32, %c0_33] : memref<11x32xf32, #tpu.memory_space<vmem>>, vector<1x32xf32>
    %cst_34 = arith.constant dense<0.000000e+00> : vector<16x32xf32>
    %50 = tpu.matmul %37, %39, %cst_34 {dimension_numbers = #tpu.dot_dimension_numbers<[1], [0], [0], [1], [0, 0, 1, 1], [], []>} : vector<16x32xf32>, vector<32x32xf32>, vector<16x32xf32> -> vector<16x32xf32>
    %51 = vector.broadcast %46 : vector<1x32xf32> to vector<16x32xf32>
    %52 = arith.addf %50, %51 : vector<16x32xf32>
    %cst_35 = arith.constant dense<0.000000e+00> : vector<16x32xf32>
    %53 = tpu.matmul %37, %41, %cst_35 {dimension_numbers = #tpu.dot_dimension_numbers<[1], [0], [0], [1], [0, 0, 1, 1], [], []>} : vector<16x32xf32>, vector<32x32xf32>, vector<16x32xf32> -> vector<16x32xf32>
    %54 = vector.broadcast %47 : vector<1x32xf32> to vector<16x32xf32>
    %55 = arith.addf %53, %54 : vector<16x32xf32>
    %cst_36 = arith.constant dense<0.000000e+00> : vector<16x32xf32>
    %56 = tpu.matmul %37, %43, %cst_36 {dimension_numbers = #tpu.dot_dimension_numbers<[1], [0], [0], [1], [0, 0, 1, 1], [], []>} : vector<16x32xf32>, vector<32x32xf32>, vector<16x32xf32> -> vector<16x32xf32>
    %57 = vector.broadcast %48 : vector<1x32xf32> to vector<16x32xf32>
    %58 = arith.addf %56, %57 : vector<16x32xf32>
    %59 = vector.extract_strided_slice %52 {offsets = [0, 0], sizes = [8, 8], strides = [1, 1]} : vector<16x32xf32> to vector<8x8xf32>
    %60 = vector.extract_strided_slice %55 {offsets = [0, 0], sizes = [8, 8], strides = [1, 1]} : vector<16x32xf32> to vector<8x8xf32>
    %cst_37 = arith.constant dense<0.000000e+00> : vector<8x8xf32>
    %61 = tpu.matmul %59, %60, %cst_37 {dimension_numbers = #tpu.dot_dimension_numbers<[1], [1], [0], [0], [0, 0, 1, 0], [], []>} : vector<8x8xf32>, vector<8x8xf32>, vector<8x8xf32> -> vector<8x8xf32>
    %62 = vector.extract_strided_slice %52 {offsets = [8, 0], sizes = [8, 8], strides = [1, 1]} : vector<16x32xf32> to vector<8x8xf32>
    %63 = vector.extract_strided_slice %55 {offsets = [8, 0], sizes = [8, 8], strides = [1, 1]} : vector<16x32xf32> to vector<8x8xf32>
    %cst_38 = arith.constant dense<0.000000e+00> : vector<8x8xf32>
    %64 = tpu.matmul %62, %63, %cst_38 {dimension_numbers = #tpu.dot_dimension_numbers<[1], [1], [0], [0], [0, 0, 1, 0], [], []>} : vector<8x8xf32>, vector<8x8xf32>, vector<8x8xf32> -> vector<8x8xf32>
    %65 = vector.extract_strided_slice %52 {offsets = [0, 8], sizes = [8, 8], strides = [1, 1]} : vector<16x32xf32> to vector<8x8xf32>
    %66 = vector.extract_strided_slice %55 {offsets = [0, 8], sizes = [8, 8], strides = [1, 1]} : vector<16x32xf32> to vector<8x8xf32>
    %cst_39 = arith.constant dense<0.000000e+00> : vector<8x8xf32>
    %67 = tpu.matmul %65, %66, %cst_39 {dimension_numbers = #tpu.dot_dimension_numbers<[1], [1], [0], [0], [0, 0, 1, 0], [], []>} : vector<8x8xf32>, vector<8x8xf32>, vector<8x8xf32> -> vector<8x8xf32>
    %68 = vector.extract_strided_slice %52 {offsets = [8, 8], sizes = [8, 8], strides = [1, 1]} : vector<16x32xf32> to vector<8x8xf32>
    %69 = vector.extract_strided_slice %55 {offsets = [8, 8], sizes = [8, 8], strides = [1, 1]} : vector<16x32xf32> to vector<8x8xf32>
    %cst_40 = arith.constant dense<0.000000e+00> : vector<8x8xf32>
    %70 = tpu.matmul %68, %69, %cst_40 {dimension_numbers = #tpu.dot_dimension_numbers<[1], [1], [0], [0], [0, 0, 1, 0], [], []>} : vector<8x8xf32>, vector<8x8xf32>, vector<8x8xf32> -> vector<8x8xf32>
    %71 = vector.extract_strided_slice %52 {offsets = [0, 16], sizes = [8, 8], strides = [1, 1]} : vector<16x32xf32> to vector<8x8xf32>
    %72 = vector.extract_strided_slice %55 {offsets = [0, 16], sizes = [8, 8], strides = [1, 1]} : vector<16x32xf32> to vector<8x8xf32>
    %cst_41 = arith.constant dense<0.000000e+00> : vector<8x8xf32>
    %73 = tpu.matmul %71, %72, %cst_41 {dimension_numbers = #tpu.dot_dimension_numbers<[1], [1], [0], [0], [0, 0, 1, 0], [], []>} : vector<8x8xf32>, vector<8x8xf32>, vector<8x8xf32> -> vector<8x8xf32>
    %74 = vector.extract_strided_slice %52 {offsets = [8, 16], sizes = [8, 8], strides = [1, 1]} : vector<16x32xf32> to vector<8x8xf32>
    %75 = vector.extract_strided_slice %55 {offsets = [8, 16], sizes = [8, 8], strides = [1, 1]} : vector<16x32xf32> to vector<8x8xf32>
    %cst_42 = arith.constant dense<0.000000e+00> : vector<8x8xf32>
    %76 = tpu.matmul %74, %75, %cst_42 {dimension_numbers = #tpu.dot_dimension_numbers<[1], [1], [0], [0], [0, 0, 1, 0], [], []>} : vector<8x8xf32>, vector<8x8xf32>, vector<8x8xf32> -> vector<8x8xf32>
    %77 = vector.extract_strided_slice %52 {offsets = [0, 24], sizes = [8, 8], strides = [1, 1]} : vector<16x32xf32> to vector<8x8xf32>
    %78 = vector.extract_strided_slice %55 {offsets = [0, 24], sizes = [8, 8], strides = [1, 1]} : vector<16x32xf32> to vector<8x8xf32>
    %cst_43 = arith.constant dense<0.000000e+00> : vector<8x8xf32>
    %79 = tpu.matmul %77, %78, %cst_43 {dimension_numbers = #tpu.dot_dimension_numbers<[1], [1], [0], [0], [0, 0, 1, 0], [], []>} : vector<8x8xf32>, vector<8x8xf32>, vector<8x8xf32> -> vector<8x8xf32>
    %80 = vector.extract_strided_slice %52 {offsets = [8, 24], sizes = [8, 8], strides = [1, 1]} : vector<16x32xf32> to vector<8x8xf32>
    %81 = vector.extract_strided_slice %55 {offsets = [8, 24], sizes = [8, 8], strides = [1, 1]} : vector<16x32xf32> to vector<8x8xf32>
    %cst_44 = arith.constant dense<0.000000e+00> : vector<8x8xf32>
    %82 = tpu.matmul %80, %81, %cst_44 {dimension_numbers = #tpu.dot_dimension_numbers<[1], [1], [0], [0], [0, 0, 1, 0], [], []>} : vector<8x8xf32>, vector<8x8xf32>, vector<8x8xf32> -> vector<8x8xf32>
    %83 = tpu.concatenate %61, %64, %67, %70, %73, %76, %79, %82 in 0 : vector<8x8xf32>, vector<8x8xf32>, vector<8x8xf32>, vector<8x8xf32>, vector<8x8xf32>, vector<8x8xf32>, vector<8x8xf32>, vector<8x8xf32> -> vector<64x8xf32>
    %cst_45 = arith.constant -1.000000e+09 : f32
    %84 = vector.broadcast %cst_45 : f32 to vector<64x8xf32>
    %85 = arith.select %11, %84, %83 : vector<64x8xi1>, vector<64x8xf32>
    %cst_46 = arith.constant dense<0xFF800000> : vector<64xf32>
    %86 = vector.multi_reduction <maximumf>, %85, %cst_46 [1] : vector<64x8xf32> to vector<64xf32>
    %87 = vector.shape_cast %86 : vector<64xf32> to vector<64x1xf32>
    %88 = vector.broadcast %87 : vector<64x1xf32> to vector<64x8xf32>
    %89 = arith.subf %85, %88 : vector<64x8xf32>
    %90 = math.exp %89 : vector<64x8xf32>
    %cst_47 = arith.constant dense<0.000000e+00> : vector<64xf32>
    %91 = vector.multi_reduction <add>, %90, %cst_47 [1] : vector<64x8xf32> to vector<64xf32>
    %92 = vector.shape_cast %91 : vector<64xf32> to vector<64x1xf32>
    %93 = tpu.reciprocal %92 {approx = true} : vector<64x1xf32> -> vector<64x1xf32>
    %94 = vector.broadcast %93 : vector<64x1xf32> to vector<64x8xf32>
    %95 = arith.mulf %90, %94 : vector<64x8xf32>
    %96 = vector.extract_strided_slice %95 {offsets = [0, 0], sizes = [8, 8], strides = [1, 1]} : vector<64x8xf32> to vector<8x8xf32>
    %97 = vector.extract_strided_slice %58 {offsets = [0, 0], sizes = [8, 8], strides = [1, 1]} : vector<16x32xf32> to vector<8x8xf32>
    %cst_48 = arith.constant dense<0.000000e+00> : vector<8x8xf32>
    %98 = tpu.matmul %96, %97, %cst_48 {dimension_numbers = #tpu.dot_dimension_numbers<[1], [0], [0], [1], [0, 0, 1, 1], [], []>} : vector<8x8xf32>, vector<8x8xf32>, vector<8x8xf32> -> vector<8x8xf32>
    %99 = vector.extract_strided_slice %45 {offsets = [0, 0], sizes = [8, 32], strides = [1, 1]} : vector<32x32xf32> to vector<8x32xf32>
    %cst_49 = arith.constant dense<0.000000e+00> : vector<8x32xf32>
    %100 = tpu.matmul %98, %99, %cst_49 {dimension_numbers = #tpu.dot_dimension_numbers<[1], [0], [0], [1], [0, 0, 1, 1], [], []>} : vector<8x8xf32>, vector<8x32xf32>, vector<8x32xf32> -> vector<8x32xf32>
    %101 = vector.extract_strided_slice %95 {offsets = [16, 0], sizes = [8, 8], strides = [1, 1]} : vector<64x8xf32> to vector<8x8xf32>
    %102 = vector.extract_strided_slice %58 {offsets = [0, 8], sizes = [8, 8], strides = [1, 1]} : vector<16x32xf32> to vector<8x8xf32>
    %cst_50 = arith.constant dense<0.000000e+00> : vector<8x8xf32>
    %103 = tpu.matmul %101, %102, %cst_50 {dimension_numbers = #tpu.dot_dimension_numbers<[1], [0], [0], [1], [0, 0, 1, 1], [], []>} : vector<8x8xf32>, vector<8x8xf32>, vector<8x8xf32> -> vector<8x8xf32>
    %104 = vector.extract_strided_slice %45 {offsets = [8, 0], sizes = [8, 32], strides = [1, 1]} : vector<32x32xf32> to vector<8x32xf32>
    %cst_51 = arith.constant dense<0.000000e+00> : vector<8x32xf32>
    %105 = tpu.matmul %103, %104, %cst_51 {dimension_numbers = #tpu.dot_dimension_numbers<[1], [0], [0], [1], [0, 0, 1, 1], [], []>} : vector<8x8xf32>, vector<8x32xf32>, vector<8x32xf32> -> vector<8x32xf32>
    %106 = arith.addf %100, %105 : vector<8x32xf32>
    %107 = vector.extract_strided_slice %95 {offsets = [32, 0], sizes = [8, 8], strides = [1, 1]} : vector<64x8xf32> to vector<8x8xf32>
    %108 = vector.extract_strided_slice %58 {offsets = [0, 16], sizes = [8, 8], strides = [1, 1]} : vector<16x32xf32> to vector<8x8xf32>
    %cst_52 = arith.constant dense<0.000000e+00> : vector<8x8xf32>
    %109 = tpu.matmul %107, %108, %cst_52 {dimension_numbers = #tpu.dot_dimension_numbers<[1], [0], [0], [1], [0, 0, 1, 1], [], []>} : vector<8x8xf32>, vector<8x8xf32>, vector<8x8xf32> -> vector<8x8xf32>
    %110 = vector.extract_strided_slice %45 {offsets = [16, 0], sizes = [8, 32], strides = [1, 1]} : vector<32x32xf32> to vector<8x32xf32>
    %cst_53 = arith.constant dense<0.000000e+00> : vector<8x32xf32>
    %111 = tpu.matmul %109, %110, %cst_53 {dimension_numbers = #tpu.dot_dimension_numbers<[1], [0], [0], [1], [0, 0, 1, 1], [], []>} : vector<8x8xf32>, vector<8x32xf32>, vector<8x32xf32> -> vector<8x32xf32>
    %112 = arith.addf %106, %111 : vector<8x32xf32>
    %113 = vector.extract_strided_slice %95 {offsets = [48, 0], sizes = [8, 8], strides = [1, 1]} : vector<64x8xf32> to vector<8x8xf32>
    %114 = vector.extract_strided_slice %58 {offsets = [0, 24], sizes = [8, 8], strides = [1, 1]} : vector<16x32xf32> to vector<8x8xf32>
    %cst_54 = arith.constant dense<0.000000e+00> : vector<8x8xf32>
    %115 = tpu.matmul %113, %114, %cst_54 {dimension_numbers = #tpu.dot_dimension_numbers<[1], [0], [0], [1], [0, 0, 1, 1], [], []>} : vector<8x8xf32>, vector<8x8xf32>, vector<8x8xf32> -> vector<8x8xf32>
    %116 = vector.extract_strided_slice %45 {offsets = [24, 0], sizes = [8, 32], strides = [1, 1]} : vector<32x32xf32> to vector<8x32xf32>
    %cst_55 = arith.constant dense<0.000000e+00> : vector<8x32xf32>
    %117 = tpu.matmul %115, %116, %cst_55 {dimension_numbers = #tpu.dot_dimension_numbers<[1], [0], [0], [1], [0, 0, 1, 1], [], []>} : vector<8x8xf32>, vector<8x32xf32>, vector<8x32xf32> -> vector<8x32xf32>
    %118 = arith.addf %112, %117 : vector<8x32xf32>
    %119 = vector.broadcast %49 : vector<1x32xf32> to vector<8x32xf32>
    %120 = arith.addf %118, %119 : vector<8x32xf32>
    %121 = vector.extract_strided_slice %95 {offsets = [8, 0], sizes = [8, 8], strides = [1, 1]} : vector<64x8xf32> to vector<8x8xf32>
    %122 = vector.extract_strided_slice %58 {offsets = [8, 0], sizes = [8, 8], strides = [1, 1]} : vector<16x32xf32> to vector<8x8xf32>
    %cst_56 = arith.constant dense<0.000000e+00> : vector<8x8xf32>
    %123 = tpu.matmul %121, %122, %cst_56 {dimension_numbers = #tpu.dot_dimension_numbers<[1], [0], [0], [1], [0, 0, 1, 1], [], []>} : vector<8x8xf32>, vector<8x8xf32>, vector<8x8xf32> -> vector<8x8xf32>
    %124 = vector.extract_strided_slice %45 {offsets = [0, 0], sizes = [8, 32], strides = [1, 1]} : vector<32x32xf32> to vector<8x32xf32>
    %cst_57 = arith.constant dense<0.000000e+00> : vector<8x32xf32>
    %125 = tpu.matmul %123, %124, %cst_57 {dimension_numbers = #tpu.dot_dimension_numbers<[1], [0], [0], [1], [0, 0, 1, 1], [], []>} : vector<8x8xf32>, vector<8x32xf32>, vector<8x32xf32> -> vector<8x32xf32>
    %126 = vector.extract_strided_slice %95 {offsets = [24, 0], sizes = [8, 8], strides = [1, 1]} : vector<64x8xf32> to vector<8x8xf32>
    %127 = vector.extract_strided_slice %58 {offsets = [8, 8], sizes = [8, 8], strides = [1, 1]} : vector<16x32xf32> to vector<8x8xf32>
    %cst_58 = arith.constant dense<0.000000e+00> : vector<8x8xf32>
    %128 = tpu.matmul %126, %127, %cst_58 {dimension_numbers = #tpu.dot_dimension_numbers<[1], [0], [0], [1], [0, 0, 1, 1], [], []>} : vector<8x8xf32>, vector<8x8xf32>, vector<8x8xf32> -> vector<8x8xf32>
    %129 = vector.extract_strided_slice %45 {offsets = [8, 0], sizes = [8, 32], strides = [1, 1]} : vector<32x32xf32> to vector<8x32xf32>
    %cst_59 = arith.constant dense<0.000000e+00> : vector<8x32xf32>
    %130 = tpu.matmul %128, %129, %cst_59 {dimension_numbers = #tpu.dot_dimension_numbers<[1], [0], [0], [1], [0, 0, 1, 1], [], []>} : vector<8x8xf32>, vector<8x32xf32>, vector<8x32xf32> -> vector<8x32xf32>
    %131 = arith.addf %125, %130 : vector<8x32xf32>
    %132 = vector.extract_strided_slice %95 {offsets = [40, 0], sizes = [8, 8], strides = [1, 1]} : vector<64x8xf32> to vector<8x8xf32>
    %133 = vector.extract_strided_slice %58 {offsets = [8, 16], sizes = [8, 8], strides = [1, 1]} : vector<16x32xf32> to vector<8x8xf32>
    %cst_60 = arith.constant dense<0.000000e+00> : vector<8x8xf32>
    %134 = tpu.matmul %132, %133, %cst_60 {dimension_numbers = #tpu.dot_dimension_numbers<[1], [0], [0], [1], [0, 0, 1, 1], [], []>} : vector<8x8xf32>, vector<8x8xf32>, vector<8x8xf32> -> vector<8x8xf32>
    %135 = vector.extract_strided_slice %45 {offsets = [16, 0], sizes = [8, 32], strides = [1, 1]} : vector<32x32xf32> to vector<8x32xf32>
    %cst_61 = arith.constant dense<0.000000e+00> : vector<8x32xf32>
    %136 = tpu.matmul %134, %135, %cst_61 {dimension_numbers = #tpu.dot_dimension_numbers<[1], [0], [0], [1], [0, 0, 1, 1], [], []>} : vector<8x8xf32>, vector<8x32xf32>, vector<8x32xf32> -> vector<8x32xf32>
    %137 = arith.addf %131, %136 : vector<8x32xf32>
    %138 = vector.extract_strided_slice %95 {offsets = [56, 0], sizes = [8, 8], strides = [1, 1]} : vector<64x8xf32> to vector<8x8xf32>
    %139 = vector.extract_strided_slice %58 {offsets = [8, 24], sizes = [8, 8], strides = [1, 1]} : vector<16x32xf32> to vector<8x8xf32>
    %cst_62 = arith.constant dense<0.000000e+00> : vector<8x8xf32>
    %140 = tpu.matmul %138, %139, %cst_62 {dimension_numbers = #tpu.dot_dimension_numbers<[1], [0], [0], [1], [0, 0, 1, 1], [], []>} : vector<8x8xf32>, vector<8x8xf32>, vector<8x8xf32> -> vector<8x8xf32>
    %141 = vector.extract_strided_slice %45 {offsets = [24, 0], sizes = [8, 32], strides = [1, 1]} : vector<32x32xf32> to vector<8x32xf32>
    %cst_63 = arith.constant dense<0.000000e+00> : vector<8x32xf32>
    %142 = tpu.matmul %140, %141, %cst_63 {dimension_numbers = #tpu.dot_dimension_numbers<[1], [0], [0], [1], [0, 0, 1, 1], [], []>} : vector<8x8xf32>, vector<8x32xf32>, vector<8x32xf32> -> vector<8x32xf32>
    %143 = arith.addf %137, %142 : vector<8x32xf32>
    %144 = vector.broadcast %49 : vector<1x32xf32> to vector<8x32xf32>
    %145 = arith.addf %143, %144 : vector<8x32xf32>
    %146 = tpu.concatenate %120, %145 in 0 : vector<8x32xf32>, vector<8x32xf32> -> vector<16x32xf32>
    %147 = arith.addf %6, %146 : vector<16x32xf32>
    %cst_64 = arith.constant dense<0.000000e+00> : vector<16xf32>
    %148 = vector.multi_reduction <add>, %147, %cst_64 [1] : vector<16x32xf32> to vector<16xf32>
    %149 = vector.shape_cast %148 : vector<16xf32> to vector<16x1xf32>
    %cst_65 = arith.constant 3.200000e+01 : f32
    %150 = vector.broadcast %cst_65 : f32 to vector<16x1xf32>
    %151 = arith.divf %149, %150 : vector<16x1xf32>
    %152 = vector.broadcast %151 : vector<16x1xf32> to vector<16x32xf32>
    %153 = arith.subf %147, %152 : vector<16x32xf32>
    %154 = arith.mulf %153, %153 : vector<16x32xf32>
    %cst_66 = arith.constant dense<0.000000e+00> : vector<16xf32>
    %155 = vector.multi_reduction <add>, %154, %cst_66 [1] : vector<16x32xf32> to vector<16xf32>
    %156 = vector.shape_cast %155 : vector<16xf32> to vector<16x1xf32>
    %cst_67 = arith.constant 0.0322580636 : f32
    %157 = vector.broadcast %cst_67 : f32 to vector<16x1xf32>
    %158 = arith.mulf %156, %157 : vector<16x1xf32>
    %159 = vector.broadcast %151 : vector<16x1xf32> to vector<16x32xf32>
    %160 = arith.subf %147, %159 : vector<16x32xf32>
    %161 = math.sqrt %158 : vector<16x1xf32>
    %cst_68 = arith.constant 9.99999997E-7 : f32
    %162 = vector.broadcast %cst_68 : f32 to vector<16x1xf32>
    %163 = arith.addf %161, %162 : vector<16x1xf32>
    %164 = vector.broadcast %163 : vector<16x1xf32> to vector<16x32xf32>
    %165 = arith.divf %160, %164 : vector<16x32xf32>
    %166 = vector.broadcast %2 : f32 to vector<16x32xf32>
    %167 = arith.mulf %166, %165 : vector<16x32xf32>
    %168 = vector.broadcast %3 : f32 to vector<16x32xf32>
    %169 = arith.addf %167, %168 : vector<16x32xf32>
    %c4_69 = arith.constant 4 : index
    %c0_70 = arith.constant 0 : index
    %c0_71 = arith.constant 0 : index
    %170 = vector.load %arg5[%c4_69, %c0_70, %c0_71] : memref<12x32x32xf32, #tpu.memory_space<vmem>>, vector<1x32x32xf32>
    %171 = vector.shape_cast %170 : vector<1x32x32xf32> to vector<32x32xf32>
    %c5_72 = arith.constant 5 : index
    %c0_73 = arith.constant 0 : index
    %c0_74 = arith.constant 0 : index
    %172 = vector.load %arg5[%c5_72, %c0_73, %c0_74] : memref<12x32x32xf32, #tpu.memory_space<vmem>>, vector<1x32x32xf32>
    %173 = vector.shape_cast %172 : vector<1x32x32xf32> to vector<32x32xf32>
    %c6 = arith.constant 6 : index
    %c0_75 = arith.constant 0 : index
    %c0_76 = arith.constant 0 : index
    %174 = vector.load %arg5[%c6, %c0_75, %c0_76] : memref<12x32x32xf32, #tpu.memory_space<vmem>>, vector<1x32x32xf32>
    %175 = vector.shape_cast %174 : vector<1x32x32xf32> to vector<32x32xf32>
    %c7 = arith.constant 7 : index
    %c0_77 = arith.constant 0 : index
    %c0_78 = arith.constant 0 : index
    %176 = vector.load %arg5[%c7, %c0_77, %c0_78] : memref<12x32x32xf32, #tpu.memory_space<vmem>>, vector<1x32x32xf32>
    %177 = vector.shape_cast %176 : vector<1x32x32xf32> to vector<32x32xf32>
    %c4_79 = arith.constant 4 : index
    %c0_80 = arith.constant 0 : index
    %178 = vector.load %arg6[%c4_79, %c0_80] : memref<11x32xf32, #tpu.memory_space<vmem>>, vector<1x32xf32>
    %c5_81 = arith.constant 5 : index
    %c0_82 = arith.constant 0 : index
    %179 = vector.load %arg6[%c5_81, %c0_82] : memref<11x32xf32, #tpu.memory_space<vmem>>, vector<1x32xf32>
    %c6_83 = arith.constant 6 : index
    %c0_84 = arith.constant 0 : index
    %180 = vector.load %arg6[%c6_83, %c0_84] : memref<11x32xf32, #tpu.memory_space<vmem>>, vector<1x32xf32>
    %c7_85 = arith.constant 7 : index
    %c0_86 = arith.constant 0 : index
    %181 = vector.load %arg6[%c7_85, %c0_86] : memref<11x32xf32, #tpu.memory_space<vmem>>, vector<1x32xf32>
    %cst_87 = arith.constant dense<0.000000e+00> : vector<16x32xf32>
    %182 = tpu.matmul %169, %171, %cst_87 {dimension_numbers = #tpu.dot_dimension_numbers<[1], [0], [0], [1], [0, 0, 1, 1], [], []>} : vector<16x32xf32>, vector<32x32xf32>, vector<16x32xf32> -> vector<16x32xf32>
    %183 = vector.broadcast %178 : vector<1x32xf32> to vector<16x32xf32>
    %184 = arith.addf %182, %183 : vector<16x32xf32>
    %cst_88 = arith.constant dense<0.000000e+00> : vector<16x32xf32>
    %185 = tpu.matmul %7, %173, %cst_88 {dimension_numbers = #tpu.dot_dimension_numbers<[1], [0], [0], [1], [0, 0, 1, 1], [], []>} : vector<16x32xf32>, vector<32x32xf32>, vector<16x32xf32> -> vector<16x32xf32>
    %186 = vector.broadcast %179 : vector<1x32xf32> to vector<16x32xf32>
    %187 = arith.addf %185, %186 : vector<16x32xf32>
    %cst_89 = arith.constant dense<0.000000e+00> : vector<16x32xf32>
    %188 = tpu.matmul %7, %175, %cst_89 {dimension_numbers = #tpu.dot_dimension_numbers<[1], [0], [0], [1], [0, 0, 1, 1], [], []>} : vector<16x32xf32>, vector<32x32xf32>, vector<16x32xf32> -> vector<16x32xf32>
    %189 = vector.broadcast %180 : vector<1x32xf32> to vector<16x32xf32>
    %190 = arith.addf %188, %189 : vector<16x32xf32>
    %191 = vector.extract_strided_slice %184 {offsets = [0, 0], sizes = [8, 8], strides = [1, 1]} : vector<16x32xf32> to vector<8x8xf32>
    %192 = vector.extract_strided_slice %187 {offsets = [0, 0], sizes = [8, 8], strides = [1, 1]} : vector<16x32xf32> to vector<8x8xf32>
    %cst_90 = arith.constant dense<0.000000e+00> : vector<8x8xf32>
    %193 = tpu.matmul %191, %192, %cst_90 {dimension_numbers = #tpu.dot_dimension_numbers<[1], [1], [0], [0], [0, 0, 1, 0], [], []>} : vector<8x8xf32>, vector<8x8xf32>, vector<8x8xf32> -> vector<8x8xf32>
    %194 = vector.extract_strided_slice %184 {offsets = [8, 0], sizes = [8, 8], strides = [1, 1]} : vector<16x32xf32> to vector<8x8xf32>
    %195 = vector.extract_strided_slice %187 {offsets = [8, 0], sizes = [8, 8], strides = [1, 1]} : vector<16x32xf32> to vector<8x8xf32>
    %cst_91 = arith.constant dense<0.000000e+00> : vector<8x8xf32>
    %196 = tpu.matmul %194, %195, %cst_91 {dimension_numbers = #tpu.dot_dimension_numbers<[1], [1], [0], [0], [0, 0, 1, 0], [], []>} : vector<8x8xf32>, vector<8x8xf32>, vector<8x8xf32> -> vector<8x8xf32>
    %197 = vector.extract_strided_slice %184 {offsets = [0, 8], sizes = [8, 8], strides = [1, 1]} : vector<16x32xf32> to vector<8x8xf32>
    %198 = vector.extract_strided_slice %187 {offsets = [0, 8], sizes = [8, 8], strides = [1, 1]} : vector<16x32xf32> to vector<8x8xf32>
    %cst_92 = arith.constant dense<0.000000e+00> : vector<8x8xf32>
    %199 = tpu.matmul %197, %198, %cst_92 {dimension_numbers = #tpu.dot_dimension_numbers<[1], [1], [0], [0], [0, 0, 1, 0], [], []>} : vector<8x8xf32>, vector<8x8xf32>, vector<8x8xf32> -> vector<8x8xf32>
    %200 = vector.extract_strided_slice %184 {offsets = [8, 8], sizes = [8, 8], strides = [1, 1]} : vector<16x32xf32> to vector<8x8xf32>
    %201 = vector.extract_strided_slice %187 {offsets = [8, 8], sizes = [8, 8], strides = [1, 1]} : vector<16x32xf32> to vector<8x8xf32>
    %cst_93 = arith.constant dense<0.000000e+00> : vector<8x8xf32>
    %202 = tpu.matmul %200, %201, %cst_93 {dimension_numbers = #tpu.dot_dimension_numbers<[1], [1], [0], [0], [0, 0, 1, 0], [], []>} : vector<8x8xf32>, vector<8x8xf32>, vector<8x8xf32> -> vector<8x8xf32>
    %203 = vector.extract_strided_slice %184 {offsets = [0, 16], sizes = [8, 8], strides = [1, 1]} : vector<16x32xf32> to vector<8x8xf32>
    %204 = vector.extract_strided_slice %187 {offsets = [0, 16], sizes = [8, 8], strides = [1, 1]} : vector<16x32xf32> to vector<8x8xf32>
    %cst_94 = arith.constant dense<0.000000e+00> : vector<8x8xf32>
    %205 = tpu.matmul %203, %204, %cst_94 {dimension_numbers = #tpu.dot_dimension_numbers<[1], [1], [0], [0], [0, 0, 1, 0], [], []>} : vector<8x8xf32>, vector<8x8xf32>, vector<8x8xf32> -> vector<8x8xf32>
    %206 = vector.extract_strided_slice %184 {offsets = [8, 16], sizes = [8, 8], strides = [1, 1]} : vector<16x32xf32> to vector<8x8xf32>
    %207 = vector.extract_strided_slice %187 {offsets = [8, 16], sizes = [8, 8], strides = [1, 1]} : vector<16x32xf32> to vector<8x8xf32>
    %cst_95 = arith.constant dense<0.000000e+00> : vector<8x8xf32>
    %208 = tpu.matmul %206, %207, %cst_95 {dimension_numbers = #tpu.dot_dimension_numbers<[1], [1], [0], [0], [0, 0, 1, 0], [], []>} : vector<8x8xf32>, vector<8x8xf32>, vector<8x8xf32> -> vector<8x8xf32>
    %209 = vector.extract_strided_slice %184 {offsets = [0, 24], sizes = [8, 8], strides = [1, 1]} : vector<16x32xf32> to vector<8x8xf32>
    %210 = vector.extract_strided_slice %187 {offsets = [0, 24], sizes = [8, 8], strides = [1, 1]} : vector<16x32xf32> to vector<8x8xf32>
    %cst_96 = arith.constant dense<0.000000e+00> : vector<8x8xf32>
    %211 = tpu.matmul %209, %210, %cst_96 {dimension_numbers = #tpu.dot_dimension_numbers<[1], [1], [0], [0], [0, 0, 1, 0], [], []>} : vector<8x8xf32>, vector<8x8xf32>, vector<8x8xf32> -> vector<8x8xf32>
    %212 = vector.extract_strided_slice %184 {offsets = [8, 24], sizes = [8, 8], strides = [1, 1]} : vector<16x32xf32> to vector<8x8xf32>
    %213 = vector.extract_strided_slice %187 {offsets = [8, 24], sizes = [8, 8], strides = [1, 1]} : vector<16x32xf32> to vector<8x8xf32>
    %cst_97 = arith.constant dense<0.000000e+00> : vector<8x8xf32>
    %214 = tpu.matmul %212, %213, %cst_97 {dimension_numbers = #tpu.dot_dimension_numbers<[1], [1], [0], [0], [0, 0, 1, 0], [], []>} : vector<8x8xf32>, vector<8x8xf32>, vector<8x8xf32> -> vector<8x8xf32>
    %215 = tpu.concatenate %193, %196, %199, %202, %205, %208, %211, %214 in 0 : vector<8x8xf32>, vector<8x8xf32>, vector<8x8xf32>, vector<8x8xf32>, vector<8x8xf32>, vector<8x8xf32>, vector<8x8xf32>, vector<8x8xf32> -> vector<64x8xf32>
    %cst_98 = arith.constant -1.000000e+09 : f32
    %216 = vector.broadcast %cst_98 : f32 to vector<64x8xf32>
    %217 = arith.select %15, %216, %215 : vector<64x8xi1>, vector<64x8xf32>
    %cst_99 = arith.constant dense<0xFF800000> : vector<64xf32>
    %218 = vector.multi_reduction <maximumf>, %217, %cst_99 [1] : vector<64x8xf32> to vector<64xf32>
    %219 = vector.shape_cast %218 : vector<64xf32> to vector<64x1xf32>
    %220 = vector.broadcast %219 : vector<64x1xf32> to vector<64x8xf32>
    %221 = arith.subf %217, %220 : vector<64x8xf32>
    %222 = math.exp %221 : vector<64x8xf32>
    %cst_100 = arith.constant dense<0.000000e+00> : vector<64xf32>
    %223 = vector.multi_reduction <add>, %222, %cst_100 [1] : vector<64x8xf32> to vector<64xf32>
    %224 = vector.shape_cast %223 : vector<64xf32> to vector<64x1xf32>
    %225 = tpu.reciprocal %224 {approx = true} : vector<64x1xf32> -> vector<64x1xf32>
    %226 = vector.broadcast %225 : vector<64x1xf32> to vector<64x8xf32>
    %227 = arith.mulf %222, %226 : vector<64x8xf32>
    %228 = vector.extract_strided_slice %227 {offsets = [0, 0], sizes = [8, 8], strides = [1, 1]} : vector<64x8xf32> to vector<8x8xf32>
    %229 = vector.extract_strided_slice %190 {offsets = [0, 0], sizes = [8, 8], strides = [1, 1]} : vector<16x32xf32> to vector<8x8xf32>
    %cst_101 = arith.constant dense<0.000000e+00> : vector<8x8xf32>
    %230 = tpu.matmul %228, %229, %cst_101 {dimension_numbers = #tpu.dot_dimension_numbers<[1], [0], [0], [1], [0, 0, 1, 1], [], []>} : vector<8x8xf32>, vector<8x8xf32>, vector<8x8xf32> -> vector<8x8xf32>
    %231 = vector.extract_strided_slice %177 {offsets = [0, 0], sizes = [8, 32], strides = [1, 1]} : vector<32x32xf32> to vector<8x32xf32>
    %cst_102 = arith.constant dense<0.000000e+00> : vector<8x32xf32>
    %232 = tpu.matmul %230, %231, %cst_102 {dimension_numbers = #tpu.dot_dimension_numbers<[1], [0], [0], [1], [0, 0, 1, 1], [], []>} : vector<8x8xf32>, vector<8x32xf32>, vector<8x32xf32> -> vector<8x32xf32>
    %233 = vector.extract_strided_slice %227 {offsets = [16, 0], sizes = [8, 8], strides = [1, 1]} : vector<64x8xf32> to vector<8x8xf32>
    %234 = vector.extract_strided_slice %190 {offsets = [0, 8], sizes = [8, 8], strides = [1, 1]} : vector<16x32xf32> to vector<8x8xf32>
    %cst_103 = arith.constant dense<0.000000e+00> : vector<8x8xf32>
    %235 = tpu.matmul %233, %234, %cst_103 {dimension_numbers = #tpu.dot_dimension_numbers<[1], [0], [0], [1], [0, 0, 1, 1], [], []>} : vector<8x8xf32>, vector<8x8xf32>, vector<8x8xf32> -> vector<8x8xf32>
    %236 = vector.extract_strided_slice %177 {offsets = [8, 0], sizes = [8, 32], strides = [1, 1]} : vector<32x32xf32> to vector<8x32xf32>
    %cst_104 = arith.constant dense<0.000000e+00> : vector<8x32xf32>
    %237 = tpu.matmul %235, %236, %cst_104 {dimension_numbers = #tpu.dot_dimension_numbers<[1], [0], [0], [1], [0, 0, 1, 1], [], []>} : vector<8x8xf32>, vector<8x32xf32>, vector<8x32xf32> -> vector<8x32xf32>
    %238 = arith.addf %232, %237 : vector<8x32xf32>
    %239 = vector.extract_strided_slice %227 {offsets = [32, 0], sizes = [8, 8], strides = [1, 1]} : vector<64x8xf32> to vector<8x8xf32>
    %240 = vector.extract_strided_slice %190 {offsets = [0, 16], sizes = [8, 8], strides = [1, 1]} : vector<16x32xf32> to vector<8x8xf32>
    %cst_105 = arith.constant dense<0.000000e+00> : vector<8x8xf32>
    %241 = tpu.matmul %239, %240, %cst_105 {dimension_numbers = #tpu.dot_dimension_numbers<[1], [0], [0], [1], [0, 0, 1, 1], [], []>} : vector<8x8xf32>, vector<8x8xf32>, vector<8x8xf32> -> vector<8x8xf32>
    %242 = vector.extract_strided_slice %177 {offsets = [16, 0], sizes = [8, 32], strides = [1, 1]} : vector<32x32xf32> to vector<8x32xf32>
    %cst_106 = arith.constant dense<0.000000e+00> : vector<8x32xf32>
    %243 = tpu.matmul %241, %242, %cst_106 {dimension_numbers = #tpu.dot_dimension_numbers<[1], [0], [0], [1], [0, 0, 1, 1], [], []>} : vector<8x8xf32>, vector<8x32xf32>, vector<8x32xf32> -> vector<8x32xf32>
    %244 = arith.addf %238, %243 : vector<8x32xf32>
    %245 = vector.extract_strided_slice %227 {offsets = [48, 0], sizes = [8, 8], strides = [1, 1]} : vector<64x8xf32> to vector<8x8xf32>
    %246 = vector.extract_strided_slice %190 {offsets = [0, 24], sizes = [8, 8], strides = [1, 1]} : vector<16x32xf32> to vector<8x8xf32>
    %cst_107 = arith.constant dense<0.000000e+00> : vector<8x8xf32>
    %247 = tpu.matmul %245, %246, %cst_107 {dimension_numbers = #tpu.dot_dimension_numbers<[1], [0], [0], [1], [0, 0, 1, 1], [], []>} : vector<8x8xf32>, vector<8x8xf32>, vector<8x8xf32> -> vector<8x8xf32>
    %248 = vector.extract_strided_slice %177 {offsets = [24, 0], sizes = [8, 32], strides = [1, 1]} : vector<32x32xf32> to vector<8x32xf32>
    %cst_108 = arith.constant dense<0.000000e+00> : vector<8x32xf32>
    %249 = tpu.matmul %247, %248, %cst_108 {dimension_numbers = #tpu.dot_dimension_numbers<[1], [0], [0], [1], [0, 0, 1, 1], [], []>} : vector<8x8xf32>, vector<8x32xf32>, vector<8x32xf32> -> vector<8x32xf32>
    %250 = arith.addf %244, %249 : vector<8x32xf32>
    %251 = vector.broadcast %181 : vector<1x32xf32> to vector<8x32xf32>
    %252 = arith.addf %250, %251 : vector<8x32xf32>
    %253 = vector.extract_strided_slice %227 {offsets = [8, 0], sizes = [8, 8], strides = [1, 1]} : vector<64x8xf32> to vector<8x8xf32>
    %254 = vector.extract_strided_slice %190 {offsets = [8, 0], sizes = [8, 8], strides = [1, 1]} : vector<16x32xf32> to vector<8x8xf32>
    %cst_109 = arith.constant dense<0.000000e+00> : vector<8x8xf32>
    %255 = tpu.matmul %253, %254, %cst_109 {dimension_numbers = #tpu.dot_dimension_numbers<[1], [0], [0], [1], [0, 0, 1, 1], [], []>} : vector<8x8xf32>, vector<8x8xf32>, vector<8x8xf32> -> vector<8x8xf32>
    %256 = vector.extract_strided_slice %177 {offsets = [0, 0], sizes = [8, 32], strides = [1, 1]} : vector<32x32xf32> to vector<8x32xf32>
    %cst_110 = arith.constant dense<0.000000e+00> : vector<8x32xf32>
    %257 = tpu.matmul %255, %256, %cst_110 {dimension_numbers = #tpu.dot_dimension_numbers<[1], [0], [0], [1], [0, 0, 1, 1], [], []>} : vector<8x8xf32>, vector<8x32xf32>, vector<8x32xf32> -> vector<8x32xf32>
    %258 = vector.extract_strided_slice %227 {offsets = [24, 0], sizes = [8, 8], strides = [1, 1]} : vector<64x8xf32> to vector<8x8xf32>
    %259 = vector.extract_strided_slice %190 {offsets = [8, 8], sizes = [8, 8], strides = [1, 1]} : vector<16x32xf32> to vector<8x8xf32>
    %cst_111 = arith.constant dense<0.000000e+00> : vector<8x8xf32>
    %260 = tpu.matmul %258, %259, %cst_111 {dimension_numbers = #tpu.dot_dimension_numbers<[1], [0], [0], [1], [0, 0, 1, 1], [], []>} : vector<8x8xf32>, vector<8x8xf32>, vector<8x8xf32> -> vector<8x8xf32>
    %261 = vector.extract_strided_slice %177 {offsets = [8, 0], sizes = [8, 32], strides = [1, 1]} : vector<32x32xf32> to vector<8x32xf32>
    %cst_112 = arith.constant dense<0.000000e+00> : vector<8x32xf32>
    %262 = tpu.matmul %260, %261, %cst_112 {dimension_numbers = #tpu.dot_dimension_numbers<[1], [0], [0], [1], [0, 0, 1, 1], [], []>} : vector<8x8xf32>, vector<8x32xf32>, vector<8x32xf32> -> vector<8x32xf32>
    %263 = arith.addf %257, %262 : vector<8x32xf32>
    %264 = vector.extract_strided_slice %227 {offsets = [40, 0], sizes = [8, 8], strides = [1, 1]} : vector<64x8xf32> to vector<8x8xf32>
    %265 = vector.extract_strided_slice %190 {offsets = [8, 16], sizes = [8, 8], strides = [1, 1]} : vector<16x32xf32> to vector<8x8xf32>
    %cst_113 = arith.constant dense<0.000000e+00> : vector<8x8xf32>
    %266 = tpu.matmul %264, %265, %cst_113 {dimension_numbers = #tpu.dot_dimension_numbers<[1], [0], [0], [1], [0, 0, 1, 1], [], []>} : vector<8x8xf32>, vector<8x8xf32>, vector<8x8xf32> -> vector<8x8xf32>
    %267 = vector.extract_strided_slice %177 {offsets = [16, 0], sizes = [8, 32], strides = [1, 1]} : vector<32x32xf32> to vector<8x32xf32>
    %cst_114 = arith.constant dense<0.000000e+00> : vector<8x32xf32>
    %268 = tpu.matmul %266, %267, %cst_114 {dimension_numbers = #tpu.dot_dimension_numbers<[1], [0], [0], [1], [0, 0, 1, 1], [], []>} : vector<8x8xf32>, vector<8x32xf32>, vector<8x32xf32> -> vector<8x32xf32>
    %269 = arith.addf %263, %268 : vector<8x32xf32>
    %270 = vector.extract_strided_slice %227 {offsets = [56, 0], sizes = [8, 8], strides = [1, 1]} : vector<64x8xf32> to vector<8x8xf32>
    %271 = vector.extract_strided_slice %190 {offsets = [8, 24], sizes = [8, 8], strides = [1, 1]} : vector<16x32xf32> to vector<8x8xf32>
    %cst_115 = arith.constant dense<0.000000e+00> : vector<8x8xf32>
    %272 = tpu.matmul %270, %271, %cst_115 {dimension_numbers = #tpu.dot_dimension_numbers<[1], [0], [0], [1], [0, 0, 1, 1], [], []>} : vector<8x8xf32>, vector<8x8xf32>, vector<8x8xf32> -> vector<8x8xf32>
    %273 = vector.extract_strided_slice %177 {offsets = [24, 0], sizes = [8, 32], strides = [1, 1]} : vector<32x32xf32> to vector<8x32xf32>
    %cst_116 = arith.constant dense<0.000000e+00> : vector<8x32xf32>
    %274 = tpu.matmul %272, %273, %cst_116 {dimension_numbers = #tpu.dot_dimension_numbers<[1], [0], [0], [1], [0, 0, 1, 1], [], []>} : vector<8x8xf32>, vector<8x32xf32>, vector<8x32xf32> -> vector<8x32xf32>
    %275 = arith.addf %269, %274 : vector<8x32xf32>
    %276 = vector.broadcast %181 : vector<1x32xf32> to vector<8x32xf32>
    %277 = arith.addf %275, %276 : vector<8x32xf32>
    %278 = tpu.concatenate %252, %277 in 0 : vector<8x32xf32>, vector<8x32xf32> -> vector<16x32xf32>
    %279 = arith.addf %147, %278 : vector<16x32xf32>
    %cst_117 = arith.constant dense<0.000000e+00> : vector<16xf32>
    %280 = vector.multi_reduction <add>, %279, %cst_117 [1] : vector<16x32xf32> to vector<16xf32>
    %281 = vector.shape_cast %280 : vector<16xf32> to vector<16x1xf32>
    %cst_118 = arith.constant 3.200000e+01 : f32
    %282 = vector.broadcast %cst_118 : f32 to vector<16x1xf32>
    %283 = arith.divf %281, %282 : vector<16x1xf32>
    %284 = vector.broadcast %283 : vector<16x1xf32> to vector<16x32xf32>
    %285 = arith.subf %279, %284 : vector<16x32xf32>
    %286 = arith.mulf %285, %285 : vector<16x32xf32>
    %cst_119 = arith.constant dense<0.000000e+00> : vector<16xf32>
    %287 = vector.multi_reduction <add>, %286, %cst_119 [1] : vector<16x32xf32> to vector<16xf32>
    %288 = vector.shape_cast %287 : vector<16xf32> to vector<16x1xf32>
    %cst_120 = arith.constant 0.0322580636 : f32
    %289 = vector.broadcast %cst_120 : f32 to vector<16x1xf32>
    %290 = arith.mulf %288, %289 : vector<16x1xf32>
    %291 = vector.broadcast %283 : vector<16x1xf32> to vector<16x32xf32>
    %292 = arith.subf %279, %291 : vector<16x32xf32>
    %293 = math.sqrt %290 : vector<16x1xf32>
    %cst_121 = arith.constant 9.99999997E-7 : f32
    %294 = vector.broadcast %cst_121 : f32 to vector<16x1xf32>
    %295 = arith.addf %293, %294 : vector<16x1xf32>
    %296 = vector.broadcast %295 : vector<16x1xf32> to vector<16x32xf32>
    %297 = arith.divf %292, %296 : vector<16x32xf32>
    %298 = vector.broadcast %4 : f32 to vector<16x32xf32>
    %299 = arith.mulf %298, %297 : vector<16x32xf32>
    %300 = vector.broadcast %5 : f32 to vector<16x32xf32>
    %301 = arith.addf %299, %300 : vector<16x32xf32>
    %c8 = arith.constant 8 : index
    %c0_122 = arith.constant 0 : index
    %c0_123 = arith.constant 0 : index
    %302 = vector.load %arg5[%c8, %c0_122, %c0_123] : memref<12x32x32xf32, #tpu.memory_space<vmem>>, vector<1x32x32xf32>
    %303 = vector.shape_cast %302 : vector<1x32x32xf32> to vector<32x32xf32>
    %cst_124 = arith.constant dense<0.000000e+00> : vector<16x32xf32>
    %304 = tpu.matmul %301, %303, %cst_124 {dimension_numbers = #tpu.dot_dimension_numbers<[1], [0], [0], [1], [0, 0, 1, 1], [], []>} : vector<16x32xf32>, vector<32x32xf32>, vector<16x32xf32> -> vector<16x32xf32>
    %c8_125 = arith.constant 8 : index
    %c0_126 = arith.constant 0 : index
    %305 = vector.load %arg6[%c8_125, %c0_126] : memref<11x32xf32, #tpu.memory_space<vmem>>, vector<1x32xf32>
    %306 = vector.broadcast %305 : vector<1x32xf32> to vector<16x32xf32>
    %307 = arith.addf %304, %306 : vector<16x32xf32>
    %cst_127 = arith.constant 0.000000e+00 : f32
    %308 = vector.broadcast %cst_127 : f32 to vector<16x32xf32>
    %309 = arith.maximumf %307, %308 : vector<16x32xf32>
    %c9 = arith.constant 9 : index
    %c0_128 = arith.constant 0 : index
    %c0_129 = arith.constant 0 : index
    %310 = vector.load %arg5[%c9, %c0_128, %c0_129] : memref<12x32x32xf32, #tpu.memory_space<vmem>>, vector<1x32x32xf32>
    %311 = vector.shape_cast %310 : vector<1x32x32xf32> to vector<32x32xf32>
    %cst_130 = arith.constant dense<0.000000e+00> : vector<16x32xf32>
    %312 = tpu.matmul %301, %311, %cst_130 {dimension_numbers = #tpu.dot_dimension_numbers<[1], [0], [0], [1], [0, 0, 1, 1], [], []>} : vector<16x32xf32>, vector<32x32xf32>, vector<16x32xf32> -> vector<16x32xf32>
    %c9_131 = arith.constant 9 : index
    %c0_132 = arith.constant 0 : index
    %313 = vector.load %arg6[%c9_131, %c0_132] : memref<11x32xf32, #tpu.memory_space<vmem>>, vector<1x32xf32>
    %314 = vector.broadcast %313 : vector<1x32xf32> to vector<16x32xf32>
    %315 = arith.addf %312, %314 : vector<16x32xf32>
    %cst_133 = arith.constant 0.000000e+00 : f32
    %316 = vector.broadcast %cst_133 : f32 to vector<16x32xf32>
    %317 = arith.maximumf %315, %316 : vector<16x32xf32>
    %c10 = arith.constant 10 : index
    %c0_134 = arith.constant 0 : index
    %c0_135 = arith.constant 0 : index
    %318 = vector.load %arg5[%c10, %c0_134, %c0_135] : memref<12x32x32xf32, #tpu.memory_space<vmem>>, vector<1x32x32xf32>
    %319 = vector.shape_cast %318 : vector<1x32x32xf32> to vector<32x32xf32>
    %cst_136 = arith.constant dense<0.000000e+00> : vector<16x32xf32>
    %320 = tpu.matmul %309, %319, %cst_136 {dimension_numbers = #tpu.dot_dimension_numbers<[1], [0], [0], [1], [0, 0, 1, 1], [], []>} : vector<16x32xf32>, vector<32x32xf32>, vector<16x32xf32> -> vector<16x32xf32>
    %321 = arith.addf %279, %320 : vector<16x32xf32>
    %c11 = arith.constant 11 : index
    %c0_137 = arith.constant 0 : index
    %c0_138 = arith.constant 0 : index
    %322 = vector.load %arg5[%c11, %c0_137, %c0_138] : memref<12x32x32xf32, #tpu.memory_space<vmem>>, vector<1x32x32xf32>
    %323 = vector.shape_cast %322 : vector<1x32x32xf32> to vector<32x32xf32>
    %cst_139 = arith.constant dense<0.000000e+00> : vector<16x32xf32>
    %324 = tpu.matmul %317, %323, %cst_139 {dimension_numbers = #tpu.dot_dimension_numbers<[1], [0], [0], [1], [0, 0, 1, 1], [], []>} : vector<16x32xf32>, vector<32x32xf32>, vector<16x32xf32> -> vector<16x32xf32>
    %325 = arith.addf %321, %324 : vector<16x32xf32>
    %c10_140 = arith.constant 10 : index
    %c0_141 = arith.constant 0 : index
    %326 = vector.load %arg6[%c10_140, %c0_141] : memref<11x32xf32, #tpu.memory_space<vmem>>, vector<1x32xf32>
    %327 = vector.broadcast %326 : vector<1x32xf32> to vector<16x32xf32>
    %328 = arith.addf %325, %327 : vector<16x32xf32>
    %c0_142 = arith.constant 0 : index
    %c0_143 = arith.constant 0 : index
    %329 = vector.load %arg7[%c0_142, %c0_143] : memref<16x32xf32, #tpu.memory_space<vmem>>, vector<16x32xf32>
    tpu.vector_store %arg7[%c0_142, %c0_143], %328 {strides = array<i32>} : memref<16x32xf32, #tpu.memory_space<vmem>>, vector<16x32xf32>,
    return
  }
}

</mosaic_0001>

<bundles_post_ra>
// kernel: decoder_block.1
= control target key start
LH: loop header
LB: loop body
LE: loop exit
PB: predicated region body
PF: predicated region fallthrough
CT: control target
= control target key end

     0   :  { %12 = vsyncpa [#allocation5], 0  ;;  %s3058_s0 = inlined_call_operand.vmem [shape: f32[6], index: 0, kind: input, shape index: {}]   ;;  %s3059_s1 = inlined_call_operand.hbm [shape: f32[16,32], index: 1, kind: input, shape index: {}]   ;;  %s3060_s2 = inlined_call_operand.hbm [shape: f32[16,32], index: 2, kind: input, shape index: {}]   ;;  %s3061_s3 = inlined_call_operand.hbm [shape: f32[16,8], index: 3, kind: input, shape index: {}]   ;;  %s3062_s4 = inlined_call_operand.hbm [shape: f32[16,8], index: 4, kind: input, shape index: {}]   ;;  %s3063_s5 = inlined_call_operand.hbm [shape: f32[12,32,32], index: 5, kind: input, shape index: {}]   ;;  %s3064_s6 = inlined_call_operand.hbm [shape: f32[11,32], index: 6, kind: input, shape index: {}]   ;;  %s3065_s7 = inlined_call_operand.hbm [shape: f32[16,32], index: 7, kind: output, shape index: {}]  }
   0x1   :  { %13 = vsyncpa [#allocation3], 0 }
   0x2   :  { %14 = vsyncpa [#allocation8], 0 }
   0x3   :  { %15 = vsyncpa [#allocation11], 0 }
   0x4   :  { %16 = vsyncpa [#allocation14], 0 }
   0x5   :  { %17 = vsyncpa [#allocation4], 0  ;;  %s44_s26 = sshll.u32 %s3060_s2, 4  ;;  %s2609_s27 = smov [#allocation7]   ;;  %s45_s26 = int_to_ptr.hbm [resolvable:$true] %s44_s26 }
   0x6   :  { %s46_s28 = sshll.u32 %s2609_s27, 4  ;;  %s70_s8 = sshll.u32 %s3062_s4, 4  ;;  %s47_s28 = int_to_ptr.vmem [resolvable:$true] %s46_s28  ;;  %s71_s8 = int_to_ptr.hbm [resolvable:$true] %s70_s8 }
   0x7   :  { %s2610_s9 = smov 128   ;;  %s2611_s10 = smov 8  }
   0x8   :  { %52 = dma.hbm_to_vmem [thread:$0]  %s45_s26, 256, %s47_s28, [#allocation8], %s2610_s9, %s2610_s9, %s2611_s10  }
   0x9   :  { %s2612_s11 = smov [#allocation10]   ;;  %s23_s2 = sshll.u32 %s3058_s0, 4  ;;  %s24_s2 = int_to_ptr.vmem [resolvable:$true] %s23_s2 }
   0xa   :  { %s72_s12 = sshll.u32 %s2612_s11, 4  ;;  %s31_s16 = sshll.u32 %s3059_s1, 4  ;;  %s73_s12 = int_to_ptr.vmem [resolvable:$true] %s72_s12  ;;  %s32_s16 = int_to_ptr.hbm [resolvable:$true] %s31_s16 }
   0xb   :  { %78 = dma.hbm_to_vmem [thread:$0]  %s71_s8, 256, %s73_s12, [#allocation11], %s2610_s9, %s2610_s9, %s2611_s10  }
   0xc   :  { %s2613_s17 = smov [#allocation2]   ;;  %s2614_s18 = smov [#allocation6]  }
   0xd   :  { %26 = dma.vmem_to_smem %s24_s2, 16, %s2613_s17, [#allocation5]  }
   0xe   :  { %s33_s19 = sshll.u32 %s2614_s18, 4  ;;  %s57_s22 = sshll.u32 %s3061_s3, 4  ;;  %s34_s19 = int_to_ptr.vmem [resolvable:$true] %s33_s19  ;;  %s58_s22 = int_to_ptr.hbm [resolvable:$true] %s57_s22 }
   0xf   :  { %39 = dma.hbm_to_vmem [thread:$0]  %s32_s16, 256, %s34_s19, [#allocation3], %s2610_s9, %s2610_s9, %s2611_s10  }
  0x10   :  { %s83_s24 = sshll.u32 %s3063_s5, 4  ;;  %s2615_s1 = smov [#allocation9]   ;;  %s84_s24 = int_to_ptr.hbm [resolvable:$true] %s83_s24 }
  0x11   :  { %s59_s25 = sshll.u32 %s2615_s1, 4  ;;  %s2616_s26 = smov [#allocation12]   ;;  %s60_s25 = int_to_ptr.vmem [resolvable:$true] %s59_s25 }
  0x12   :  { %65 = dma.hbm_to_vmem [thread:$0]  %s58_s22, 256, %s60_s25, [#allocation8], %s2610_s9, %s2610_s9, %s2611_s10  }
  0x13   :  { %s85_s3 = sshll.u32 %s2616_s26, 4  ;;  %s96_s29 = sshll.u32 %s3064_s6, 4  ;;  %s86_s3 = int_to_ptr.vmem [resolvable:$true] %s85_s3  ;;  %s97_s29 = int_to_ptr.hbm [resolvable:$true] %s96_s29 }
  0x14   :  { %91 = dma.hbm_to_vmem [thread:$0]  %s84_s24, 6144, %s86_s3, [#allocation11], %s2610_s9, %s2610_s9, %s2611_s10  }
  0x15   :  { %s2617_s5 = smov [#allocation13]  }
  0x16   :  { %s98_s30 = sshll.u32 %s2617_s5, 4  ;;  %s99_s30 = int_to_ptr.vmem [resolvable:$true] %s98_s30 }
  0x17   :  { %104 = dma.hbm_to_vmem [thread:$0]  %s97_s29, 256, %s99_s30, [#allocation14], %s2610_s9, %s2610_s9, %s2611_s10  }
  0x18   :  { %2597 = dma.done.wait [#allocation5], 16  }
  0x19   :  { %2598 = vsyncadd [#allocation5], 4294967280 }
  0x1a   :  { %2599 = dma.done.wait [#allocation3], 256  }
  0x1b   :  { %2600 = vsyncadd [#allocation3], 4294967040 }
  0x1c   :  { %2601 = dma.done.wait [#allocation8], 512  }
  0x1d   :  { %2602 = vsyncadd [#allocation8], 4294966784 }
  0x1e   :  { %2603 = dma.done.wait [#allocation11], 6400  }
  0x1f   :  { %2604 = vsyncadd [#allocation11], 4294960896 }
  0x20   :  { %2605 = dma.done.wait [#allocation14], 256  }
  0x21   :  { %2606 = vsyncadd [#allocation14], 4294967040 }
  0x22   :  { %133 = sfence }
  0x23   :  { %v2702_v0 = vld [vmem:[#allocation6] sm:$0xff]  ;;  %vm152_vm0 = vcmask 261120   ;;  %v2706_v2 = vld [vmem:[#allocation6 + $0x8] sm:$0xff]  ;;  %v2618_v4 = vmov 32.0   ;;  %v245_v21 = vld [vmem:[#allocation12 + $0x18] sm:$0xff]  ;;  %s2726_s6 = sld [smem:[#allocation2]] }
  0x24   :  { %v153_v1 = vsel %vm152_vm0, %v2702_v0, 0.0  ;;  %v156_v3 = vsel %vm152_vm0, %v2706_v2, 0.0  ;;  %2327 = vrcp.f32 %v2618_v4  ;;  %v250_v22 = vld [vmem:[#allocation12 + $0x38] sm:$0xff]  ;;  %284 = vmatpush.msra.mxu0 %v245_v21  ;;  %v244_v24 = vld [vmem:[#allocation12 + $0x10] sm:$0xff]  ;;  %v243_v28 = vld [vmem:[#allocation12 + $0x8] sm:$0xff]  ;;  %s2728_s8 = sld [smem:[#allocation2 + $0x1]] }
  0x25   :  { %154 = vadd.xlane.f32.xlu0 %v153_v1  ;;  %v255_v23 = vld [vmem:[#allocation12 + $0x58] sm:$0xff]  ;;  %308 = vmatpush.msra.mxu1 %v250_v22  ;;  %v249_v25 = vld [vmem:[#allocation12 + $0x30] sm:$0xff]  ;;  %v248_v29 = vld [vmem:[#allocation12 + $0x28] sm:$0xff]  ;;  %vm343_vm14 = vcmask 64512   ;;  %s2619_s11 = smov 112   ;;  %s2620_s12 = smov 120  }
  0x26   :  { %v254_v26 = vld [vmem:[#allocation12 + $0x50] sm:$0xff]  ;;  %332 = vmatpush.msra.mxu2 %v255_v23  ;;  %285 = vmatpush.msra.mxu0 %v244_v24  ;;  %v253_v31 = vld [vmem:[#allocation12 + $0x48] sm:$0xff]  ;;  %v242_v32 = vld [vmem:[#allocation12] sm:$0xff]  ;;  %s2621_s13 = smov 104   ;;  %s2879_s14 = sld [smem:[#allocation2 + $0x2]] }
  0x27   :  { %309 = vmatpush.msra.mxu1 %v249_v25  ;;  %v247_v33 = vld [vmem:[#allocation12 + $0x20] sm:$0xff]  ;;  %s2881_s2 = sld [smem:[#allocation2 + $0x3]]  ;;  %s2622_s16 = smov [#allocation15]  }
  0x28   :  { %333 = vmatpush.msra.mxu2 %v254_v26  ;;  %286 = vmatpush.msra.mxu0 %v243_v28  ;;  %v252_v34 = vld [vmem:[#allocation12 + $0x40] sm:$0xff]  ;;  %s3033_s4 = sld [smem:[#allocation2 + $0x4]]  ;;  %s2194_s17 = sshll.u32 %s2622_s16, 4  ;;  %s2195_s17 = int_to_ptr.vmem [resolvable:$true] %s2194_s17 }
  0x29   :  { %310 = vmatpush.msra.mxu1 %v248_v29  ;;  %v2317_v28 = vld [vmem:[#allocation13 + $0x1] ss:$0 sm:$0xff]  ;;  %s3035_s15 = sld [smem:[#allocation2 + $0x5]]  ;;  %s2196_s20 = sshll.u32 %s3065_s7, 4  ;;  %s2197_s20 = int_to_ptr.hbm [resolvable:$true] %s2196_s20 }
  0x2a   :  { %v2328_v5 = vpop.eup %2327  ;;  %334 = vmatpush.msra.mxu2 %v253_v31  ;;  %287 = vmatpush.msra.mxu0 %v242_v32 }
  0x2b   :  { %v160_v6 = vmul.f32 32.0, %v2328_v5  ;;  %vm164_vm1 = vweird.f32 %v2328_v5  ;;  %311 = vmatpush.msra.mxu1 %v247_v33 }
  0x2c   :  { %335 = vmatpush.msra.mxu2 %v252_v34 }
  0x2d   :  { %157 = vadd.xlane.f32.xlu0 %v156_v3  ;;  %v161_v7 = vsub.f32 1.0, %v160_v6 }
  0x2f   :  { %v162_v8 = vmul.f32 %v2328_v5, %v161_v7 }
  0x31   :  { %v163_v9 = vadd.f32 %v2328_v5, %v162_v8 }
  0x33   :  { %v2710_v10 = vsel %vm164_vm1, %v2328_v5, %v163_v9  ;;  %v236_v9 = vstv %s2726_s6 }
  0x98   :  { %v155_v11 = vpop.xlane.xlu0 %154 }
  0x99   :  { %v166_v12 = vmul.f32 %v2710_v10, %v155_v11 }
  0x9b   :  { %v2714_v13 = vsub.f32 %v2702_v0, %v166_v12 }
  0x9d   :  { %v170_v14 = vmul.f32 %v2714_v13, %v2714_v13 }
  0x9f   :  { %v172_v15 = vsel %vm152_vm0, %v170_v14, 0.0 }
  0xa0   :  { %173 = vadd.xlane.f32.xlu1 %v172_v15  ;;  %v158_v16 = vpop.xlane.xlu0 %157 }
  0xa1   :  { %v167_v17 = vmul.f32 %v2710_v10, %v158_v16  ;;  %v239_v16 = vstv %s2728_s8 }
  0xa3   :  { %v2721_v18 = vsub.f32 %v2706_v2, %v167_v17 }
  0xa5   :  { %v171_v19 = vmul.f32 %v2721_v18, %v2721_v18 }
  0xa7   :  { %v175_v20 = vsel %vm152_vm0, %v171_v19, 0.0 }
  0xa8   :  { %176 = vadd.xlane.f32.xlu1 %v175_v20 }
 0x113   :  { %v174_v27 = vpop.xlane.xlu1 %173 }
 0x114   :  { %v178_v30 = vmul.f32 0.032258064, %v174_v27  ;;  %v2316_v27 = vld [vmem:[#allocation13] ss:$0 sm:$0xff] }
 0x116   :  { %2329 = vrsqrt.f32 %v178_v30  ;;  %vm187_vm2 = vcmp.eq.f32.partialorder %v178_v30, inf  ;;  %v190_v47 = vand.u32 2147483648, %v178_v30  ;;  %vm189_vm3 = vcmp.eq.f32.partialorder %v178_v30, 0.0 }
 0x11b   :  { %v177_v35 = vpop.xlane.xlu1 %176 }
 0x11c   :  { %v2330_v36 = vpop.eup %2329  ;;  %v179_v37 = vmul.f32 0.032258064, %v177_v35 }
 0x11d   :  { %v181_v38 = vmul.f32 %v2330_v36, %v178_v30 }
 0x11e   :  { %2331 = vrsqrt.f32 %v179_v37  ;;  %vm199_vm4 = vcmp.eq.f32.partialorder %v179_v37, inf  ;;  %v202_v54 = vand.u32 2147483648, %v179_v37  ;;  %vm201_vm5 = vcmp.eq.f32.partialorder %v179_v37, 0.0 }
 0x11f   :  { %v182_v39 = vmul.f32 %v2330_v36, %v181_v38 }
 0x121   :  { %v183_v40 = vmul.f32 0.5, %v182_v39  ;;  %v2755_v39 = vld [vmem:[#allocation13 + $0x2] ss:$0 sm:$0xff] }
 0x123   :  { %v184_v41 = vsub.f32 1.5, %v183_v40 }
 0x124   :  { %v2332_v42 = vpop.eup %2331 }
 0x125   :  { %v185_v43 = vmul.f32 %v2330_v36, %v184_v41  ;;  %v193_v44 = vmul.f32 %v2332_v42, %v179_v37 }
 0x127   :  { %v186_v45 = vmul.f32 %v185_v43, %v178_v30  ;;  %v194_v46 = vmul.f32 %v2332_v42, %v193_v44 }
 0x129   :  { %v188_v48 = vsel %vm187_vm2, %v178_v30, %v186_v45  ;;  %v195_v49 = vmul.f32 0.5, %v194_v46 }
 0x12a   :  { %v191_v50 = vsel %vm189_vm3, %v190_v47, %v188_v48  ;;  %v2766_v47 = vld [vmem:[#allocation9] sm:$0xff] }
 0x12b   :  { %v196_v51 = vsub.f32 1.5, %v195_v49  ;;  %v204_v52 = vadd.f32 1e-06, %v191_v50  ;;  %vm146_vm15 = vcmp.eq.f32.partialorder %v2766_v47, 0.0  ;;  %v259_v47 = vld [vmem:[#allocation12 + $0x70] sm:$0xff] }
 0x12d   :  { %v197_v53 = vmul.f32 %v2332_v42, %v196_v51  ;;  %2333 = vrcp.f32 %v204_v52  ;;  %v217_v62 = vand.u32 2147483648, %v204_v52  ;;  %v215_v1 = vand.u32 2147483647, %v204_v52 }
 0x12e   :  { %vm211_vm7 = vweird.f32 %v204_v52 }
 0x12f   :  { %v198_v55 = vmul.f32 %v197_v53, %v179_v37  ;;  %v218_v5 = vor.u32 1.1754944e-38, %v217_v62  ;;  %vm216_vm9 = vcmp.eq.f32.partialorder %v215_v1, 8.507059e+37 }
 0x131   :  { %v200_v56 = vsel %vm199_vm4, %v179_v37, %v198_v55 }
 0x132   :  { %v203_v57 = vsel %vm201_vm5, %v202_v54, %v200_v56 }
 0x133   :  { %v2334_v58 = vpop.eup %2333  ;;  %v205_v59 = vadd.f32 1e-06, %v203_v57 }
 0x134   :  { %v207_v60 = vmul.f32 %v2334_v58, %v204_v52  ;;  %vm212_vm6 = vweird.f32 %v2334_v58 }
 0x135   :  { %2335 = vrcp.f32 %v205_v59  ;;  %vm213_vm8 = vmor %vm211_vm7, %vm212_vm6  ;;  %vm226_vm10 = vweird.f32 %v205_v59  ;;  %v232_v11 = vand.u32 2147483648, %v205_v59  ;;  %v230_v15 = vand.u32 2147483647, %v205_v59 }
 0x136   :  { %v208_v61 = vsub.f32 1.0, %v207_v60 }
 0x137   :  { %v233_v20 = vor.u32 1.1754944e-38, %v232_v11  ;;  %vm231_vm13 = vcmp.eq.f32.partialorder %v230_v15, 8.507059e+37 }
 0x138   :  { %v209_v63 = vmul.f32 %v2334_v58, %v208_v61 }
 0x13a   :  { %v210_v3 = vadd.f32 %v2334_v58, %v209_v63  ;;  %v2787_v63 = vld [vmem:[#allocation9 + $0x8] sm:$0xff] }
 0x13b   :  { %v2336_v4 = vpop.eup %2335  ;;  %vm147_vm1 = vcmp.eq.f32.partialorder %v2787_v63, 0.0 }
 0x13c   :  { %v214_v6 = vsel %vm213_vm8, %v2334_v58, %v210_v3  ;;  %v222_v7 = vmul.f32 %v2336_v4, %v205_v59  ;;  %vm227_vm11 = vweird.f32 %v2336_v4 }
 0x13d   :  { %v219_v8 = vsel %vm216_vm9, %v218_v5, %v214_v6  ;;  %vm228_vm12 = vmor %vm226_vm10, %vm227_vm11 }
 0x13e   :  { %v220_v12 = vmul.f32 %v219_v8, %v2714_v13  ;;  %v223_v14 = vsub.f32 1.0, %v222_v7 }
 0x140   :  { %v237_v17 = vmul.f32 %v236_v9, %v220_v12  ;;  %v224_v19 = vmul.f32 %v2336_v4, %v223_v14 }
 0x142   :  { %v240_v21 = vadd.f32 %v239_v16, %v237_v17  ;;  %v225_v22 = vadd.f32 %v2336_v4, %v224_v19 }
 0x144   :  { %2218 = vmatmul.msk.f32.vlgmr.msra.gmra.mxu0 %vm152_vm0, %v240_v21  ;;  %2220 = vmatmul.msk.f32.vlgmr.msra.gmra.mxu1 %vm152_vm0, %v240_v21  ;;  %v229_v23 = vsel %vm228_vm12, %v2336_v4, %v225_v22 }
 0x145   :  { %2222 = vmatmul.msk.f32.vlgmr.msra.gmra.mxu2 %vm152_vm0, %v240_v21  ;;  %v234_v24 = vsel %vm231_vm13, %v233_v20, %v229_v23 }
 0x146   :  { %v235_v13 = vmul.f32 %v234_v24, %v2721_v18 }
 0x148   :  { %v238_v25 = vmul.f32 %v236_v9, %v235_v13 }
 0x14a   :  { %v241_v26 = vadd.f32 %v239_v16, %v238_v25 }
 0x14c   :  { %2219 = vmatmul.msk.f32.gmra.mxu0 %vm152_vm0, %v241_v26  ;;  %2221 = vmatmul.msk.f32.gmra.mxu1 %vm152_vm0, %v241_v26 }
 0x14d   :  { %2223 = vmatmul.msk.f32.gmra.mxu2 %vm152_vm0, %v241_v26 }
 0x1c1   :  { %v289_v29 = vpop.f32.mrf.mxu0  ;;  %v313_v30 = vpop.f32.mrf.mxu1 }
 0x1c2   :  { %v290_v31 = vadd.f32 %v2316_v27, %v289_v29  ;;  %v314_v32 = vadd.f32 %v2317_v28, %v313_v30 }
 0x1c4   :  { %454 = vrot.lane.b32.xlu0 %v314_v32, %s2619_s11  ;;  %398 = vrot.lane.b32.xlu2 %v314_v32, %s2620_s12 }
 0x1c5   :  { %2224 = vmatpush.xpose.msk.msra.mxu3 %vm343_vm14, %v314_v32  ;;  %452 = vrot.lane.b32.xlu1 %v290_v31, %s2619_s11 }
 0x1c8   :  { %2225 = vmatmul.msk.f32.vlgmr.msra.gmra.mxu3 %vm343_vm14, %v290_v31  ;;  %v337_v40 = vpop.f32.mrf.mxu2 }
 0x1c9   :  { %v292_v18 = vpop.f32.mrf.mxu0  ;;  %v316_v33 = vpop.f32.mrf.mxu1  ;;  %v2758_v41 = vadd.f32 %v2755_v39, %v337_v40 }
 0x1ca   :  { %v293_v34 = vadd.f32 %v2316_v27, %v292_v18  ;;  %v317_v35 = vadd.f32 %v2317_v28, %v316_v33 }
 0x1cc   :  { %2226 = vmatpush.xpose.msk.msrb.mxu3 %vm343_vm14, %v317_v35  ;;  %424 = vrot.lane.b32.xlu0 %v293_v34, %s2620_s12 }
 0x1cd   :  { %396 = vrot.lane.b32.xlu2 %v290_v31, %s2620_s12 }
 0x1d0   :  { %2227 = vmatmul.msk.f32.vlgmr.msrb.gmra.mxu3 %vm343_vm14, %v293_v34  ;;  %v340_v21 = vpop.f32.mrf.mxu2 }
 0x1d1   :  { %v2797_v13 = vadd.f32 %v2755_v39, %v340_v21 }
 0x1d5   :  { %510 = vrot.lane.b32.xlu2 %v314_v32, %s2621_s13 }
 0x1dd   :  { %508 = vrot.lane.b32.xlu2 %v290_v31, %s2621_s13 }
 0x1e5   :  { %426 = vrot.lane.b32.xlu2 %v317_v35, %s2620_s12 }
 0x21e   :  { %v399_v36 = vpop.permute.xlu2 %398 }
 0x21f   :  { %2228 = vmatpush.xpose.msk.msra.mxu3 %vm343_vm14, %v399_v36 }
 0x227   :  { %v397_v37 = vpop.permute.xlu2 %396 }
 0x228   :  { %2229 = vmatmul.msk.f32.vlgmr.msra.gmra.mxu3 %vm343_vm14, %v397_v37 }
 0x22f   :  { %v511_v38 = vpop.permute.xlu2 %510 }
 0x230   :  { %2236 = vmatpush.xpose.msk.msrb.mxu3 %vm343_vm14, %v511_v38 }
 0x236   :  { %v455_v42 = vpop.permute.xlu0 %454 }
 0x237   :  { %v509_v43 = vpop.permute.xlu2 %508  ;;  %2232 = vmatpush.xpose.msk.msrb.mxu1 %vm343_vm14, %v455_v42  ;;  %v453_v44 = vpop.permute.xlu1 %452 }
 0x238   :  { %2237 = vmatmul.msk.f32.vlgmr.msrb.gmra.mxu3 %vm343_vm14, %v509_v43 }
 0x23a   :  { %2233 = vmatmul.msk.f32.vlgmr.msrb.gmra.mxu1 %vm343_vm14, %v453_v44 }
 0x23b   :  { %678 = vmatpush.msra.mxu1 %v2758_v41 }
 0x23e   :  { %v425_v46 = vpop.permute.xlu0 %424 }
 0x23f   :  { %v427_v45 = vpop.permute.xlu2 %426 }
 0x240   :  { %2230 = vmatpush.xpose.msk.msrb.mxu0 %vm343_vm14, %v427_v45 }
 0x243   :  { %2231 = vmatmul.msk.f32.vlgmr.msrb.gmra.mxu0 %vm343_vm14, %v425_v46  ;;  %v258_v46 = vld [vmem:[#allocation12 + $0x68] sm:$0xff] }
 0x244   :  { %728 = vmatpush.msra.mxu3 %v258_v46 }
 0x24b   :  { %v367_v48 = vpop.f32.mrf.mxu3 }
 0x24c   :  { %v564_v49 = vsel %vm146_vm15, -1e+09, %v367_v48 }
 0x24d   :  { %v572_v50 = vsel %vm343_vm14, %v564_v49, -inf }
 0x24e   :  { %573 = vmax.xlane.f32.xlu2 %v572_v50 }
 0x253   :  { %v2772_v51 = vpop.f32.mrf.mxu3 }
 0x2ab   :  { %v421_v52 = vpop.f32.mrf.mxu3 }
 0x2ac   :  { %v566_v53 = vsel %vm146_vm15, -1e+09, %v421_v52 }
 0x2ad   :  { %v578_v54 = vsel %vm343_vm14, %v566_v53, -inf }
 0x2ae   :  { %579 = vmax.xlane.f32.xlu1 %v578_v54  ;;  %v565_v54 = vsel %vm147_vm1, -1e+09, %v2772_v51 }
 0x2b7   :  { %v477_v55 = vpop.f32.mrf.mxu1 }
 0x2b8   :  { %v568_v56 = vsel %vm146_vm15, -1e+09, %v477_v55 }
 0x2b9   :  { %v584_v57 = vsel %vm343_vm14, %v568_v56, -inf }
 0x2ba   :  { %585 = vmax.xlane.f32.xlu0 %v584_v57 }
 0x2bb   :  { %v533_v27 = vpop.f32.mrf.mxu3 }
 0x2bc   :  { %v570_v28 = vsel %vm146_vm15, -1e+09, %v533_v27 }
 0x2bd   :  { %v590_v29 = vsel %vm343_vm14, %v570_v28, -inf }
 0x2c0   :  { %v449_v1 = vpop.f32.mrf.mxu0 }
 0x2c1   :  { %v574_v58 = vpop.xlane.xlu2 %573  ;;  %v567_v3 = vsel %vm147_vm1, -1e+09, %v449_v1 }
 0x2c2   :  { %v596_v59 = vsub.f32 %v564_v49, %v574_v58  ;;  %v581_v4 = vsel %vm343_vm14, %v567_v3, -inf }
 0x2c4   :  { %v604_v60 = vmul.f32 1.442695, %v596_v59 }
 0x2c6   :  { %2337 = vpow2.f32 %v604_v60 }
 0x2c7   :  { %482 = vrot.lane.b32.xlu1 %v317_v35, %s2619_s11 }
 0x2cc   :  { %v2338_v61 = vpop.eup %2337 }
 0x2cd   :  { %v620_v62 = vsel %vm343_vm14, %v2338_v61, 0.0 }
 0x2ce   :  { %621 = vadd.xlane.f32.xlu2 %v620_v62 }
 0x2cf   :  { %756 = vrot.lane.b32.xlu1 %v2758_v41, %s2619_s11 }
 0x2d7   :  { %536 = vrot.lane.b32.xlu1 %v293_v34, %s2621_s13 }
 0x2e6   :  { %480 = vrot.lane.b32.xlu2 %v293_v34, %s2619_s11  ;;  %v2812_v34 = vld [vmem:[#allocation12 + $0x60] sm:$0xff] }
 0x2ee   :  { %538 = vrot.lane.b32.xlu2 %v317_v35, %s2621_s13 }
 0x317   :  { %582 = vmax.xlane.f32.xlu2 %v581_v4 }
 0x321   :  { %v580_v5 = vpop.xlane.xlu1 %579 }
 0x322   :  { %v598_v8 = vsub.f32 %v566_v53, %v580_v5 }
 0x324   :  { %v608_v11 = vmul.f32 1.442695, %v598_v8 }
 0x32d   :  { %v586_v6 = vpop.xlane.xlu0 %585 }
 0x32e   :  { %v600_v7 = vsub.f32 %v568_v56, %v586_v6  ;;  %v575_v56 = vsel %vm343_vm14, %v565_v54, -inf }
 0x330   :  { %v612_v9 = vmul.f32 1.442695, %v600_v7 }
 0x332   :  { %2339 = vpow2.f32 %v612_v9 }
 0x333   :  { %2341 = vpow2.f32 %v608_v11 }
 0x338   :  { %v2340_v12 = vpop.eup %2339 }
 0x339   :  { %v483_v14 = vpop.permute.xlu1 %482  ;;  %v632_v15 = vsel %vm343_vm14, %v2340_v12, 0.0  ;;  %v2342_v16 = vpop.eup %2341 }
 0x33a   :  { %2234 = vmatpush.xpose.msk.msrb.mxu2 %vm343_vm14, %v483_v14  ;;  %633 = vadd.xlane.f32.xlu0 %v632_v15  ;;  %v626_v20 = vsel %vm343_vm14, %v2342_v16, 0.0 }
 0x341   :  { %v622_v17 = vpop.xlane.xlu2 %621  ;;  %v757_v19 = vpop.permute.xlu1 %756 }
 0x342   :  { %2343 = vrcp.f32 %v622_v17  ;;  %777 = vmatpush.msrb.mxu1 %v757_v19  ;;  %627 = vadd.xlane.f32.xlu0 %v626_v20 }
 0x348   :  { %v2344_v22 = vpop.eup %2343 }
 0x349   :  { %v652_v23 = vmul.f32 %v2344_v22, %v2338_v61  ;;  %v481_v24 = vpop.permute.xlu2 %480  ;;  %v537_v26 = vpop.permute.xlu1 %536 }
 0x34a   :  { %2235 = vmatmul.msk.f32.vlgmr.msrb.gmra.mxu2 %vm343_vm14, %v481_v24 }
 0x34b   :  { %2240 = vmatmul.msk.f32.vlgmr.msra.gmra.mxu1 %vm343_vm14, %v652_v23 }
 0x34c   :  { %876 = vmatpush.msra.mxu1 %v2797_v13 }
 0x351   :  { %v539_v25 = vpop.permute.xlu2 %538 }
 0x352   :  { %2238 = vmatpush.xpose.msk.msra.mxu0 %vm343_vm14, %v539_v25 }
 0x355   :  { %2239 = vmatmul.msk.f32.vlgmr.msra.gmra.mxu0 %vm343_vm14, %v537_v26 }
 0x356   :  { %684 = vrot.lane.b32.xlu0 %v2758_v41, %s2620_s12  ;;  %751 = vmatpush.msrb.mxu0 %v2812_v34 }
 0x380   :  { %591 = vmax.xlane.f32.xlu0 %v590_v29 }
 0x38a   :  { %v583_v30 = vpop.xlane.xlu2 %582 }
 0x38b   :  { %v599_v31 = vsub.f32 %v567_v3, %v583_v30 }
 0x38d   :  { %v610_v32 = vmul.f32 1.442695, %v599_v31  ;;  %v260_v31 = vld [vmem:[#allocation12 + $0x78] sm:$0xff] }
 0x38e   :  { %850 = vmatpush.msra.mxu0 %v260_v31 }
 0x38f   :  { %2345 = vpow2.f32 %v610_v32 }
 0x394   :  { %806 = vrot.lane.b32.xlu0 %v2758_v41, %s2621_s13 }
 0x395   :  { %v2346_v18 = vpop.eup %2345 }
 0x396   :  { %v629_v33 = vsel %vm343_vm14, %v2346_v18, 0.0 }
 0x397   :  { %630 = vadd.xlane.f32.xlu1 %v629_v33 }
 0x3ad   :  { %v634_v35 = vpop.xlane.xlu0 %633 }
 0x3ae   :  { %2347 = vrcp.f32 %v634_v35 }
 0x3b0   :  { %882 = vrot.lane.b32.xlu1 %v2797_v13, %s2620_s12 }
 0x3b4   :  { %v2348_v36 = vpop.eup %2347 }
 0x3b5   :  { %v656_v37 = vmul.f32 %v2348_v36, %v2340_v12  ;;  %v628_v38 = vpop.xlane.xlu0 %627 }
 0x3b6   :  { %2349 = vrcp.f32 %v628_v38 }
 0x3b7   :  { %2244 = vmatmul.msk.f32.vlgmr.msrb.gmra.mxu1 %vm343_vm14, %v656_v37 }
 0x3bc   :  { %v2350_v39 = vpop.eup %2349 }
 0x3bd   :  { %v654_v40 = vmul.f32 %v2350_v39, %v2342_v16 }
 0x3c8   :  { %v680_v41 = vpop.f32.mrf.mxu1  ;;  %v685_v42 = vpop.permute.xlu0 %684 }
 0x3c9   :  { %2243 = vmatmul.msk.f32.vlgmr.msrb.gmra.mxu0 %vm343_vm14, %v680_v41  ;;  %705 = vmatpush.msra.mxu2 %v685_v42 }
 0x3ca   :  { %2241 = vmatmul.msk.f32.vlgmr.msra.gmra.mxu2 %vm343_vm14, %v654_v40  ;;  %949 = vmatpush.msrb.mxu0 %v2812_v34  ;;  %v2319_v34 = vld [vmem:[#allocation13 + $0x3] ss:$0 sm:$0xff] }
 0x3cb   :  { %800 = vmatpush.msrb.mxu2 %v259_v47 }
 0x3cd   :  { %v505_v57 = vpop.f32.mrf.mxu2 }
 0x3ce   :  { %v569_v58 = vsel %vm147_vm1, -1e+09, %v505_v57 }
 0x3cf   :  { %v587_v59 = vsel %vm343_vm14, %v569_v58, -inf }
 0x3d2   :  { %v561_v43 = vpop.f32.mrf.mxu0 }
 0x3d3   :  { %v571_v44 = vsel %vm147_vm1, -1e+09, %v561_v43 }
 0x3d4   :  { %v593_v45 = vsel %vm343_vm14, %v571_v44, -inf }
 0x3d5   :  { %594 = vmax.xlane.f32.xlu0 %v593_v45 }
 0x3e9   :  { %1004 = vrot.lane.b32.xlu0 %v2797_v13, %s2621_s13 }
 0x3f3   :  { %v592_v48 = vpop.xlane.xlu0 %591 }
 0x3f4   :  { %v602_v49 = vsub.f32 %v570_v28, %v592_v48 }
 0x3f6   :  { %v616_v50 = vmul.f32 1.442695, %v602_v49 }
 0x3f8   :  { %2351 = vpow2.f32 %v616_v50 }
 0x3fe   :  { %v2352_v52 = vpop.eup %2351 }
 0x3ff   :  { %v638_v53 = vsel %vm343_vm14, %v2352_v52, 0.0 }
 0x400   :  { %639 = vadd.xlane.f32.xlu2 %v638_v53 }
 0x406   :  { %v807_v55 = vpop.permute.xlu0 %806 }
 0x407   :  { %827 = vmatpush.msrb.mxu3 %v807_v55 }
 0x408   :  { %576 = vmax.xlane.f32.xlu2 %v575_v56 }
 0x40a   :  { %v631_v60 = vpop.xlane.xlu1 %630 }
 0x40b   :  { %2353 = vrcp.f32 %v631_v60 }
 0x410   :  { %588 = vmax.xlane.f32.xlu2 %v587_v59 }
 0x411   :  { %v2354_v51 = vpop.eup %2353 }
 0x412   :  { %v655_v1 = vmul.f32 %v2354_v51, %v2346_v18 }
 0x422   :  { %v883_v61 = vpop.permute.xlu1 %882 }
 0x423   :  { %903 = vmatpush.msra.mxu2 %v883_v61 }
 0x434   :  { %v779_v62 = vpop.f32.mrf.mxu1 }
 0x435   :  { %2245 = vmatmul.msk.f32.vlgmr.msrb.gmra.mxu2 %vm343_vm14, %v779_v62 }
 0x436   :  { %998 = vmatpush.msrb.mxu2 %v259_v47 }
 0x43d   :  { %2249 = vmatmul.msk.f32.vlgmr.msra.gmra.mxu2 %vm343_vm14, %v655_v1 }
 0x446   :  { %v753_v27 = vpop.f32.mrf.mxu0 }
 0x448   :  { %v595_v4 = vpop.xlane.xlu0 %594 }
 0x449   :  { %v603_v11 = vsub.f32 %v571_v44, %v595_v4  ;;  %v1146_v4 = vld [vmem:[#allocation12 + $0xa8] sm:$0xff] }
 0x44b   :  { %v618_v14 = vmul.f32 1.442695, %v603_v11  ;;  %v1141_v11 = vld [vmem:[#allocation12 + $0x88] sm:$0xff] }
 0x44d   :  { %v707_v3 = vpop.f32.mrf.mxu2 }
 0x44e   :  { %2242 = vmatmul.msk.f32.vlgmr.msra.gmra.mxu3 %vm343_vm14, %v707_v3  ;;  %v1148_v3 = vld [vmem:[#allocation12 + $0xb8] sm:$0xff] }
 0x44f   :  { %926 = vmatpush.msra.mxu3 %v258_v46  ;;  %1212 = vmatpush.msra.mxu2 %v1148_v3 }
 0x45b   :  { %v1005_v9 = vpop.permute.xlu0 %1004 }
 0x473   :  { %v640_v63 = vpop.xlane.xlu2 %639 }
 0x474   :  { %2355 = vrcp.f32 %v640_v63  ;;  %v1147_v63 = vld [vmem:[#allocation12 + $0xb0] sm:$0xff] }
 0x475   :  { %1213 = vmatpush.msra.mxu2 %v1147_v63 }
 0x477   :  { %1214 = vmatpush.msra.mxu2 %v1146_v4  ;;  %v2321_v4 = vld [vmem:[#allocation13 + $0x4] ss:$0 sm:$0xff] }
 0x47a   :  { %v2356_v5 = vpop.eup %2355 }
 0x47b   :  { %v658_v6 = vmul.f32 %v2356_v5, %v2352_v52  ;;  %v577_v7 = vpop.xlane.xlu2 %576  ;;  %v1145_v5 = vld [vmem:[#allocation12 + $0xa0] sm:$0xff] }
 0x47c   :  { %v597_v8 = vsub.f32 %v565_v54, %v577_v7  ;;  %1215 = vmatpush.msra.mxu2 %v1145_v5  ;;  %v1143_v7 = vld [vmem:[#allocation12 + $0x98] sm:$0xff] }
 0x47d   :  { %2246 = vmatmul.msk.f32.vlgmr.msrb.gmra.mxu3 %vm343_vm14, %v658_v6  ;;  %v2868_v6 = vld [vmem:[#allocation7] sm:$0xff] }
 0x47e   :  { %v606_v12 = vmul.f32 1.442695, %v597_v8  ;;  %1025 = vmatpush.msrb.mxu3 %v1005_v9 }
 0x480   :  { %2357 = vpow2.f32 %v606_v12  ;;  %v1140_v12 = vld [vmem:[#allocation12 + $0x80] sm:$0xff] }
 0x481   :  { %2359 = vpow2.f32 %v618_v14 }
 0x483   :  { %v589_v15 = vpop.xlane.xlu2 %588 }
 0x484   :  { %v601_v16 = vsub.f32 %v569_v58, %v589_v15 }
 0x486   :  { %v2358_v17 = vpop.eup %2357  ;;  %v614_v19 = vmul.f32 1.442695, %v601_v16 }
 0x487   :  { %v623_v20 = vsel %vm343_vm14, %v2358_v17, 0.0  ;;  %v2360_v21 = vpop.eup %2359 }
 0x488   :  { %2361 = vpow2.f32 %v614_v19  ;;  %624 = vadd.xlane.f32.xlu2 %v623_v20  ;;  %v641_v24 = vsel %vm343_vm14, %v2360_v21, 0.0 }
 0x48e   :  { %v2362_v22 = vpop.eup %2361 }
 0x48f   :  { %v635_v23 = vsel %vm343_vm14, %v2362_v22, 0.0 }
 0x490   :  { %636 = vadd.xlane.f32.xlu1 %v635_v23  ;;  %642 = vadd.xlane.f32.xlu2 %v641_v24 }
 0x4a8   :  { %954 = vrot.lane.b32.xlu2 %v2797_v13, %s2619_s11 }
 0x4b8   :  { %v802_v25 = vpop.f32.mrf.mxu2 }
 0x4c0   :  { %v905_v26 = vpop.f32.mrf.mxu2 }
 0x4c1   :  { %2250 = vmatmul.msk.f32.vlgmr.msra.gmra.mxu3 %vm343_vm14, %v905_v26 }
 0x4d1   :  { %v730_v28 = vpop.f32.mrf.mxu3 }
 0x4d2   :  { %v754_v29 = vadd.f32 %v753_v27, %v730_v28 }
 0x4d4   :  { %v805_v30 = vadd.f32 %v802_v25, %v754_v29 }
 0x4fb   :  { %v625_v32 = vpop.xlane.xlu2 %624 }
 0x4fc   :  { %2363 = vrcp.f32 %v625_v32 }
 0x500   :  { %v829_v18 = vpop.f32.mrf.mxu3 }
 0x501   :  { %2247 = vmatmul.msk.f32.vlgmr.msra.gmra.mxu0 %vm343_vm14, %v829_v18 }
 0x502   :  { %v2364_v33 = vpop.eup %2363  ;;  %1048 = vmatpush.msra.mxu0 %v260_v31 }
 0x503   :  { %v653_v13 = vmul.f32 %v2364_v33, %v2358_v17  ;;  %v637_v35 = vpop.xlane.xlu1 %636  ;;  %v643_v36 = vpop.xlane.xlu2 %642 }
 0x504   :  { %2365 = vrcp.f32 %v637_v35 }
 0x505   :  { %2367 = vrcp.f32 %v643_v36  ;;  %2248 = vmatmul.msk.f32.vlgmr.msra.gmra.mxu1 %vm343_vm14, %v653_v13 }
 0x50a   :  { %v2366_v37 = vpop.eup %2365 }
 0x50b   :  { %v2368_v38 = vpop.eup %2367  ;;  %v657_v39 = vmul.f32 %v2366_v37, %v2362_v22  ;;  %v955_v40 = vpop.permute.xlu2 %954 }
 0x50c   :  { %v659_v41 = vmul.f32 %v2368_v38, %v2360_v21  ;;  %975 = vmatpush.msrb.mxu1 %v955_v40  ;;  %v1133_v40 = vstv %s2879_s14 }
 0x50d   :  { %2252 = vmatmul.msk.f32.vlgmr.msrb.gmra.mxu1 %vm343_vm14, %v657_v39 }
 0x50e   :  { %2254 = vmatmul.msk.f32.vlgmr.msrb.gmra.mxu3 %vm343_vm14, %v659_v41  ;;  %1182 = vmatpush.msra.mxu1 %v1143_v7 }
 0x544   :  { %v928_v48 = vpop.f32.mrf.mxu3 }
 0x57e   :  { %v852_v42 = vpop.f32.mrf.mxu0 }
 0x57f   :  { %v855_v43 = vadd.f32 %v852_v42, %v805_v30 }
 0x581   :  { %v857_v44 = vadd.f32 %v2319_v34, %v855_v43 }
 0x582   :  { %v878_v45 = vpop.f32.mrf.mxu1 }
 0x583   :  { %v2849_v46 = vadd.f32 %v857_v44, %v2702_v0  ;;  %2251 = vmatmul.msk.f32.vlgmr.msrb.gmra.mxu0 %vm343_vm14, %v878_v45  ;;  %v2887_v44 = vld [vmem:[#allocation13 + $0x5] ss:$0 sm:$0xff] }
 0x585   :  { %v1057_v47 = vsel %vm152_vm0, %v2849_v46, 0.0 }
 0x586   :  { %1058 = vadd.xlane.f32.xlu2 %v1057_v47 }
 0x58a   :  { %v977_v49 = vpop.f32.mrf.mxu1 }
 0x58b   :  { %2253 = vmatmul.msk.f32.vlgmr.msrb.gmra.mxu2 %vm343_vm14, %v977_v49  ;;  %v143_v49 = vld [vmem:[#allocation7 + $0x8] sm:$0xff] }
 0x591   :  { %v1027_v50 = vpop.f32.mrf.mxu3 }
 0x592   :  { %2255 = vmatmul.msk.f32.vlgmr.msra.gmra.mxu0 %vm343_vm14, %v1027_v50 }
 0x593   :  { %2258 = vmatmul.msk.f32.vlgmr.msra.gmra.mxu2 %vm152_vm0, %v2868_v6 }
 0x59b   :  { %2259 = vmatmul.msk.f32.gmra.mxu2 %vm152_vm0, %v143_v49 }
 0x5f9   :  { %v1059_v52 = vpop.xlane.xlu2 %1058 }
 0x5fa   :  { %v1063_v53 = vmul.f32 %v1059_v52, %v2710_v10 }
 0x5fc   :  { %v2858_v54 = vsub.f32 %v2849_v46, %v1063_v53 }
 0x5fe   :  { %v1067_v0 = vmul.f32 %v2858_v54, %v2858_v54 }
 0x600   :  { %v1069_v55 = vsel %vm152_vm0, %v1067_v0, 0.0  ;;  %v951_v56 = vpop.f32.mrf.mxu0 }
 0x601   :  { %1070 = vadd.xlane.f32.xlu1 %v1069_v55  ;;  %v952_v57 = vadd.f32 %v951_v56, %v928_v48  ;;  %v1153_v56 = vld [vmem:[#allocation12 + $0xd8] sm:$0xff] }
 0x602   :  { %1236 = vmatpush.msra.mxu3 %v1153_v56 }
 0x60e   :  { %v1000_v58 = vpop.f32.mrf.mxu2 }
 0x60f   :  { %v1003_v59 = vadd.f32 %v1000_v58, %v952_v57  ;;  %v1050_v60 = vpop.f32.mrf.mxu0  ;;  %v1152_v57 = vld [vmem:[#allocation12 + $0xd0] sm:$0xff] }
 0x610   :  { %1237 = vmatpush.msra.mxu3 %v1152_v57 }
 0x611   :  { %v1053_v61 = vadd.f32 %v1050_v60, %v1003_v59  ;;  %v1151_v59 = vld [vmem:[#allocation12 + $0xc8] sm:$0xff] }
 0x612   :  { %1238 = vmatpush.msra.mxu3 %v1151_v59 }
 0x613   :  { %v1054_v62 = vadd.f32 %v2319_v34, %v1053_v61  ;;  %v1136_v34 = vstv %s2881_s2 }
 0x615   :  { %v2864_v51 = vadd.f32 %v1054_v62, %v2706_v2  ;;  %v1142_v2 = vld [vmem:[#allocation12 + $0x90] sm:$0xff]  ;;  %v1150_v62 = vld [vmem:[#allocation12 + $0xc0] sm:$0xff] }
 0x616   :  { %1183 = vmatpush.msra.mxu1 %v1142_v2  ;;  %v1217_v45 = vpop.f32.mrf.mxu2  ;;  %1239 = vmatpush.msra.mxu3 %v1150_v62 }
 0x617   :  { %v1060_v1 = vsel %vm152_vm0, %v2864_v51, 0.0  ;;  %v2890_v47 = vadd.f32 %v2887_v44, %v1217_v45  ;;  %2260 = vmatmul.msk.f32.vlgmr.msra.gmra.mxu3 %vm152_vm0, %v2868_v6 }
 0x618   :  { %1061 = vadd.xlane.f32.xlu1 %v1060_v1  ;;  %1184 = vmatpush.msra.mxu1 %v1141_v11 }
 0x619   :  { %2262 = vmatpush.xpose.msk.msrb.mxu0 %vm343_vm14, %v2890_v47 }
 0x61a   :  { %1185 = vmatpush.msra.mxu1 %v1140_v12 }
 0x61f   :  { %2261 = vmatmul.msk.f32.gmra.mxu3 %vm152_vm0, %v143_v49 }
 0x631   :  { %1357 = vrot.lane.b32.xlu1 %v2890_v47, %s2619_s11 }
 0x639   :  { %1301 = vrot.lane.b32.xlu1 %v2890_v47, %s2620_s12 }
 0x674   :  { %v1071_v8 = vpop.xlane.xlu1 %1070 }
 0x675   :  { %v1075_v9 = vmul.f32 0.032258064, %v1071_v8 }
 0x677   :  { %2369 = vrsqrt.f32 %v1075_v9  ;;  %vm1084_vm2 = vcmp.eq.f32.partialorder %v1075_v9, inf  ;;  %v1087_v22 = vand.u32 2147483648, %v1075_v9  ;;  %vm1086_vm3 = vcmp.eq.f32.partialorder %v1075_v9, 0.0 }
 0x67d   :  { %v2370_v14 = vpop.eup %2369 }
 0x67e   :  { %v1078_v15 = vmul.f32 %v2370_v14, %v1075_v9 }
 0x680   :  { %v1079_v16 = vmul.f32 %v2370_v14, %v1078_v15 }
 0x682   :  { %v1080_v17 = vmul.f32 0.5, %v1079_v16 }
 0x684   :  { %v1081_v19 = vsub.f32 1.5, %v1080_v17 }
 0x686   :  { %v1082_v20 = vmul.f32 %v2370_v14, %v1081_v19 }
 0x688   :  { %v1083_v21 = vmul.f32 %v1082_v20, %v1075_v9 }
 0x68a   :  { %v1085_v23 = vsel %vm1084_vm2, %v1075_v9, %v1083_v21 }
 0x68b   :  { %v1088_v24 = vsel %vm1086_vm3, %v1087_v22, %v1085_v23  ;;  %v1062_v25 = vpop.xlane.xlu1 %1061 }
 0x68c   :  { %v1101_v26 = vadd.f32 1e-06, %v1088_v24  ;;  %v1064_v27 = vmul.f32 %v1062_v25, %v2710_v10  ;;  %v1220_v25 = vpop.f32.mrf.mxu2 }
 0x68e   :  { %2371 = vrcp.f32 %v1101_v26  ;;  %v2874_v28 = vsub.f32 %v2864_v51, %v1064_v27  ;;  %v1114_v33 = vand.u32 2147483648, %v1101_v26  ;;  %v1112_v35 = vand.u32 2147483647, %v1101_v26 }
 0x68f   :  { %vm1108_vm5 = vweird.f32 %v1101_v26 }
 0x690   :  { %v1068_v29 = vmul.f32 %v2874_v28, %v2874_v28  ;;  %v1115_v37 = vor.u32 1.1754944e-38, %v1114_v33  ;;  %vm1113_vm7 = vcmp.eq.f32.partialorder %v1112_v35, 8.507059e+37 }
 0x692   :  { %v1072_v30 = vsel %vm152_vm0, %v1068_v29, 0.0  ;;  %v2322_v29 = vld [vmem:[#allocation13 + $0x6] ss:$0 sm:$0xff] }
 0x693   :  { %1073 = vadd.xlane.f32.xlu0 %v1072_v30 }
 0x694   :  { %v2372_v31 = vpop.eup %2371 }
 0x695   :  { %v1104_v32 = vmul.f32 %v2372_v31, %v1101_v26  ;;  %vm1109_vm4 = vweird.f32 %v2372_v31  ;;  %v1221_v26 = vadd.f32 %v2887_v44, %v1220_v25 }
 0x696   :  { %vm1110_vm6 = vmor %vm1108_vm5, %vm1109_vm4 }
 0x697   :  { %v1105_v18 = vsub.f32 1.0, %v1104_v32  ;;  %2264 = vmatpush.xpose.msk.msra.mxu0 %vm343_vm14, %v1221_v26 }
 0x699   :  { %v1106_v13 = vmul.f32 %v2372_v31, %v1105_v18 }
 0x69b   :  { %v1107_v36 = vadd.f32 %v2372_v31, %v1106_v13 }
 0x69d   :  { %v1111_v38 = vsel %vm1110_vm6, %v2372_v31, %v1107_v36  ;;  %v1241_v31 = vpop.f32.mrf.mxu3 }
 0x69e   :  { %v1116_v39 = vsel %vm1113_vm7, %v1115_v37, %v1111_v38  ;;  %v2924_v18 = vadd.f32 %v2322_v29, %v1241_v31 }
 0x69f   :  { %v1117_v41 = vmul.f32 %v1116_v39, %v2858_v54 }
 0x6a1   :  { %v1134_v42 = vmul.f32 %v1133_v40, %v1117_v41 }
 0x6a3   :  { %v1137_v43 = vadd.f32 %v1136_v34, %v1134_v42  ;;  %v1358_v22 = vpop.permute.xlu1 %1357 }
 0x6a4   :  { %2270 = vmatpush.xpose.msk.msrb.mxu3 %vm343_vm14, %v1358_v22 }
 0x6a5   :  { %2256 = vmatmul.msk.f32.vlgmr.msra.gmra.mxu1 %vm152_vm0, %v1137_v43  ;;  %v1244_v36 = vpop.f32.mrf.mxu3 }
 0x6a7   :  { %1329 = vrot.lane.b32.xlu0 %v1221_v26, %s2620_s12 }
 0x6a8   :  { %1581 = vmatpush.msra.mxu3 %v2924_v18 }
 0x6ab   :  { %v1302_v23 = vpop.permute.xlu1 %1301 }
 0x6ac   :  { %2266 = vmatpush.xpose.msk.msrb.mxu1 %vm343_vm14, %v1302_v23 }
 0x706   :  { %v1074_v48 = vpop.xlane.xlu0 %1073 }
 0x707   :  { %v1076_v50 = vmul.f32 0.032258064, %v1074_v48 }
 0x709   :  { %2373 = vrsqrt.f32 %v1076_v50  ;;  %vm1096_vm8 = vcmp.eq.f32.partialorder %v1076_v50, inf  ;;  %v1099_v61 = vand.u32 2147483648, %v1076_v50  ;;  %vm1098_vm9 = vcmp.eq.f32.partialorder %v1076_v50, 0.0 }
 0x70f   :  { %v2374_v52 = vpop.eup %2373 }
 0x710   :  { %v1090_v53 = vmul.f32 %v2374_v52, %v1076_v50 }
 0x712   :  { %v1091_v54 = vmul.f32 %v2374_v52, %v1090_v53 }
 0x714   :  { %v1092_v0 = vmul.f32 0.5, %v1091_v54 }
 0x716   :  { %v1093_v55 = vsub.f32 1.5, %v1092_v0 }
 0x718   :  { %v1094_v58 = vmul.f32 %v2374_v52, %v1093_v55 }
 0x71a   :  { %v1095_v60 = vmul.f32 %v1094_v58, %v1076_v50 }
 0x71c   :  { %v1097_v1 = vsel %vm1096_vm8, %v1076_v50, %v1095_v60  ;;  %v2950_v60 = vadd.f32 %v2322_v29, %v1244_v36 }
 0x71d   :  { %v1100_v3 = vsel %vm1098_vm9, %v1099_v61, %v1097_v1  ;;  %v2955_v61 = vld [vmem:[#allocation10 + $0x8] sm:$0xff] }
 0x71e   :  { %v1102_v63 = vadd.f32 1e-06, %v1100_v3  ;;  %vm151_vm1 = vcmp.eq.f32.partialorder %v2955_v61, 0.0 }
 0x720   :  { %2375 = vrcp.f32 %v1102_v63  ;;  %v1129_v11 = vand.u32 2147483648, %v1102_v63  ;;  %v1127_v12 = vand.u32 2147483647, %v1102_v63  ;;  %vm1123_vm11 = vweird.f32 %v1102_v63 }
 0x722   :  { %v1187_v5 = vpop.f32.mrf.mxu1  ;;  %v1130_v15 = vor.u32 1.1754944e-38, %v1129_v11  ;;  %vm1128_vm13 = vcmp.eq.f32.partialorder %v1127_v12, 8.507059e+37 }
 0x723   :  { %v2901_v7 = vadd.f32 %v2321_v4, %v1187_v5 }
 0x725   :  { %1355 = vrot.lane.b32.xlu2 %v2901_v7, %s2619_s11  ;;  %2263 = vmatmul.msk.f32.vlgmr.msrb.gmra.mxu0 %vm343_vm14, %v2901_v7 }
 0x726   :  { %v2376_v2 = vpop.eup %2375  ;;  %1299 = vrot.lane.b32.xlu1 %v2901_v7, %s2620_s12 }
 0x727   :  { %v1119_v8 = vmul.f32 %v2376_v2, %v1102_v63  ;;  %vm1124_vm10 = vweird.f32 %v2376_v2 }
 0x728   :  { %vm1125_vm12 = vmor %vm1123_vm11, %vm1124_vm10 }
 0x729   :  { %v1120_v9 = vsub.f32 1.0, %v1119_v8 }
 0x72b   :  { %v1121_v6 = vmul.f32 %v2376_v2, %v1120_v9 }
 0x72d   :  { %v1122_v14 = vadd.f32 %v2376_v2, %v1121_v6 }
 0x72f   :  { %v1126_v16 = vsel %vm1125_vm12, %v2376_v2, %v1122_v14 }
 0x730   :  { %v1131_v17 = vsel %vm1128_vm13, %v1130_v15, %v1126_v16  ;;  %v2969_v16 = vld [vmem:[#allocation12 + $0xe0] sm:$0xff] }
 0x731   :  { %v1132_v19 = vmul.f32 %v1131_v17, %v2874_v28  ;;  %v2919_v28 = vld [vmem:[#allocation10] sm:$0xff] }
 0x732   :  { %vm150_vm15 = vcmp.eq.f32.partialorder %v2919_v28, 0.0 }
 0x733   :  { %v1135_v20 = vmul.f32 %v1133_v40, %v1132_v19  ;;  %v1330_v40 = vpop.permute.xlu0 %1329 }
 0x734   :  { %2268 = vmatpush.xpose.msk.msrb.mxu2 %vm343_vm14, %v1330_v40 }
 0x735   :  { %v1138_v21 = vadd.f32 %v1136_v34, %v1135_v20 }
 0x737   :  { %2257 = vmatmul.msk.f32.gmra.mxu1 %vm152_vm0, %v1138_v21 }
 0x77f   :  { %v1356_v24 = vpop.permute.xlu2 %1355 }
 0x780   :  { %2271 = vmatmul.msk.f32.vlgmr.msrb.gmra.mxu3 %vm343_vm14, %v1356_v24 }
 0x798   :  { %v1300_v27 = vpop.permute.xlu1 %1299 }
 0x799   :  { %2267 = vmatmul.msk.f32.vlgmr.msrb.gmra.mxu1 %vm343_vm14, %v1300_v27 }
 0x7a2   :  { %v1270_v30 = vpop.f32.mrf.mxu0 }
 0x7a3   :  { %v1467_v32 = vsel %vm150_vm15, -1e+09, %v1270_v30 }
 0x7a4   :  { %v1475_v33 = vsel %vm343_vm14, %v1467_v32, -inf }
 0x7a5   :  { %1476 = vmax.xlane.f32.xlu2 %v1475_v33 }
 0x7b4   :  { %v1190_v13 = vpop.f32.mrf.mxu1 }
 0x7b5   :  { %v1191_v35 = vadd.f32 %v2321_v4, %v1190_v13 }
 0x7b7   :  { %1327 = vrot.lane.b32.xlu1 %v1191_v35, %s2620_s12  ;;  %2265 = vmatmul.msk.f32.vlgmr.msra.gmra.mxu0 %vm343_vm14, %v1191_v35 }
 0x803   :  { %v1380_v37 = vpop.f32.mrf.mxu3 }
 0x804   :  { %v1471_v38 = vsel %vm150_vm15, -1e+09, %v1380_v37 }
 0x805   :  { %v1487_v39 = vsel %vm343_vm14, %v1471_v38, -inf }
 0x806   :  { %1488 = vmax.xlane.f32.xlu1 %v1487_v39 }
 0x816   :  { %v1324_v48 = vpop.f32.mrf.mxu1 }
 0x817   :  { %v1469_v49 = vsel %vm150_vm15, -1e+09, %v1324_v48  ;;  %v1156_v48 = vld [vmem:[#allocation12 + $0xe8] sm:$0xff] }
 0x818   :  { %v1477_v41 = vpop.xlane.xlu2 %1476  ;;  %v1481_v50 = vsel %vm343_vm14, %v1469_v49, -inf }
 0x819   :  { %v1499_v34 = vsub.f32 %v1467_v32, %v1477_v41 }
 0x81b   :  { %v1507_v42 = vmul.f32 1.442695, %v1499_v34 }
 0x81d   :  { %2377 = vpow2.f32 %v1507_v42 }
 0x81f   :  { %1659 = vrot.lane.b32.xlu1 %v2924_v18, %s2619_s11 }
 0x823   :  { %v2378_v43 = vpop.eup %2377 }
 0x824   :  { %v1523_v44 = vsel %vm343_vm14, %v2378_v43, 0.0 }
 0x825   :  { %1524 = vadd.xlane.f32.xlu0 %v1523_v44 }
 0x827   :  { %1439 = vrot.lane.b32.xlu1 %v1191_v35, %s2621_s13 }
 0x829   :  { %v1328_v45 = vpop.permute.xlu1 %1327 }
 0x82a   :  { %2269 = vmatmul.msk.f32.vlgmr.msrb.gmra.mxu2 %vm343_vm14, %v1328_v45 }
 0x839   :  { %1411 = vrot.lane.b32.xlu0 %v2901_v7, %s2621_s13 }
 0x841   :  { %1385 = vrot.lane.b32.xlu0 %v1221_v26, %s2619_s11 }
 0x851   :  { %1482 = vmax.xlane.f32.xlu1 %v1481_v50 }
 0x86a   :  { %1587 = vrot.lane.b32.xlu1 %v2924_v18, %s2620_s12 }
 0x879   :  { %v1489_v52 = vpop.xlane.xlu1 %1488 }
 0x87a   :  { %v1503_v53 = vsub.f32 %v1471_v38, %v1489_v52 }
 0x87c   :  { %v1515_v54 = vmul.f32 1.442695, %v1503_v53 }
 0x87e   :  { %2379 = vpow2.f32 %v1515_v54 }
 0x884   :  { %v2380_v0 = vpop.eup %2379 }
 0x885   :  { %v1535_v55 = vsel %vm343_vm14, %v2380_v0, 0.0 }
 0x886   :  { %1536 = vadd.xlane.f32.xlu2 %v1535_v55 }
 0x891   :  { %v1660_v56 = vpop.permute.xlu1 %1659 }
 0x892   :  { %1680 = vmatpush.msrb.mxu3 %v1660_v56 }
 0x898   :  { %v1525_v57 = vpop.xlane.xlu0 %1524 }
 0x899   :  { %2381 = vrcp.f32 %v1525_v57  ;;  %v1440_v4 = vpop.permute.xlu1 %1439 }
 0x89e   :  { %1413 = vrot.lane.b32.xlu2 %v2890_v47, %s2621_s13 }
 0x89f   :  { %v2382_v58 = vpop.eup %2381 }
 0x8a0   :  { %v1555_v59 = vmul.f32 %v2382_v58, %v2378_v43 }
 0x8a2   :  { %2278 = vmatmul.msk.f32.vlgmr.msra.gmra.mxu3 %vm343_vm14, %v1555_v59 }
 0x8a3   :  { %1779 = vmatpush.msra.mxu3 %v2950_v60 }
 0x8a6   :  { %1441 = vrot.lane.b32.xlu2 %v1221_v26, %s2621_s13  ;;  %v1157_v26 = vld [vmem:[#allocation12 + $0xf0] sm:$0xff] }
 0x8ab   :  { %v1412_v62 = vpop.permute.xlu0 %1411 }
 0x8ad   :  { %v1352_v1 = vpop.f32.mrf.mxu2 }
 0x8ae   :  { %v1470_v3 = vsel %vm151_vm1, -1e+09, %v1352_v1  ;;  %1383 = vrot.lane.b32.xlu2 %v1191_v35, %s2619_s11  ;;  %v1296_v35 = vpop.f32.mrf.mxu0 }
 0x8af   :  { %v1484_v47 = vsel %vm343_vm14, %v1470_v3, -inf  ;;  %v1468_v37 = vsel %vm151_vm1, -1e+09, %v1296_v35 }
 0x8b0   :  { %1485 = vmax.xlane.f32.xlu0 %v1484_v47  ;;  %v1478_v38 = vsel %vm343_vm14, %v1468_v37, -inf }
 0x8b3   :  { %v1386_v63 = vpop.permute.xlu0 %1385 }
 0x8b4   :  { %2272 = vmatpush.xpose.msk.msrb.mxu0 %vm343_vm14, %v1386_v63 }
 0x8c4   :  { %v1483_v5 = vpop.xlane.xlu1 %1482 }
 0x8c5   :  { %v1501_v7 = vsub.f32 %v1469_v49, %v1483_v5 }
 0x8c7   :  { %v1511_v2 = vmul.f32 1.442695, %v1501_v7 }
 0x8c9   :  { %2383 = vpow2.f32 %v1511_v2 }
 0x8cf   :  { %v2384_v8 = vpop.eup %2383 }
 0x8d0   :  { %v1529_v9 = vsel %vm343_vm14, %v2384_v8, 0.0 }
 0x8d7   :  { %1530 = vadd.xlane.f32.xlu2 %v1529_v9 }
 0x8dc   :  { %v1588_v11 = vpop.permute.xlu1 %1587 }
 0x8dd   :  { %1608 = vmatpush.msra.mxu0 %v1588_v11 }
 0x8ef   :  { %1785 = vrot.lane.b32.xlu2 %v2950_v60, %s2620_s12 }
 0x8f9   :  { %v1537_v6 = vpop.xlane.xlu2 %1536 }
 0x8fa   :  { %2385 = vrcp.f32 %v1537_v6 }
 0x900   :  { %v2386_v12 = vpop.eup %2385 }
 0x901   :  { %v1559_v14 = vmul.f32 %v2386_v12, %v2380_v0  ;;  %v1414_v15 = vpop.permute.xlu2 %1413 }
 0x902   :  { %2274 = vmatpush.xpose.msk.msra.mxu1 %vm343_vm14, %v1414_v15 }
 0x903   :  { %2282 = vmatmul.msk.f32.vlgmr.msrb.gmra.mxu3 %vm343_vm14, %v1559_v14 }
 0x905   :  { %2275 = vmatmul.msk.f32.vlgmr.msra.gmra.mxu1 %vm343_vm14, %v1412_v62 }
 0x906   :  { %1631 = vmatpush.msrb.mxu1 %v1156_v48 }
 0x909   :  { %v1442_v17 = vpop.permute.xlu2 %1441 }
 0x90a   :  { %2276 = vmatpush.xpose.msk.msra.mxu2 %vm343_vm14, %v1442_v17 }
 0x90d   :  { %2277 = vmatmul.msk.f32.vlgmr.msra.gmra.mxu2 %vm343_vm14, %v1440_v4 }
 0x90e   :  { %1654 = vmatpush.msrb.mxu2 %v2969_v16 }
 0x911   :  { %v1384_v19 = vpop.permute.xlu2 %1383 }
 0x912   :  { %2273 = vmatmul.msk.f32.vlgmr.msrb.gmra.mxu0 %vm343_vm14, %v1384_v19 }
 0x913   :  { %1703 = vmatpush.msrb.mxu0 %v1157_v26 }
 0x923   :  { %v1486_v20 = vpop.xlane.xlu0 %1485 }
 0x924   :  { %v1502_v21 = vsub.f32 %v1470_v3, %v1486_v20 }
 0x925   :  { %v1583_v22 = vpop.f32.mrf.mxu3 }
 0x926   :  { %v1513_v23 = vmul.f32 1.442695, %v1502_v21  ;;  %2281 = vmatmul.msk.f32.vlgmr.msrb.gmra.mxu2 %vm343_vm14, %v1583_v22 }
 0x928   :  { %2387 = vpow2.f32 %v1513_v23 }
 0x92e   :  { %v2388_v24 = vpop.eup %2387 }
 0x92f   :  { %v1532_v25 = vsel %vm343_vm14, %v2388_v24, 0.0 }
 0x930   :  { %1533 = vadd.xlane.f32.xlu0 %v1532_v25 }
 0x94a   :  { %v1531_v27 = vpop.xlane.xlu2 %1530 }
 0x94b   :  { %2389 = vrcp.f32 %v1531_v27 }
 0x951   :  { %v2390_v29 = vpop.eup %2389 }
 0x952   :  { %v1557_v30 = vmul.f32 %v2390_v29, %v2384_v8  ;;  %v1786_v31 = vpop.permute.xlu2 %1785 }
 0x954   :  { %2279 = vmatmul.msk.f32.vlgmr.msra.gmra.mxu0 %vm343_vm14, %v1557_v30 }
 0x955   :  { %1806 = vmatpush.msra.mxu0 %v1786_v31 }
 0x982   :  { %v1436_v32 = vpop.f32.mrf.mxu1 }
 0x983   :  { %v1473_v33 = vsel %vm150_vm15, -1e+09, %v1436_v32 }
 0x984   :  { %v1493_v13 = vsel %vm343_vm14, %v1473_v33, -inf }
 0x985   :  { %1494 = vmax.xlane.f32.xlu0 %v1493_v13 }
 0x986   :  { %v1682_v36 = vpop.f32.mrf.mxu3 }
 0x987   :  { %2283 = vmatmul.msk.f32.vlgmr.msrb.gmra.mxu0 %vm343_vm14, %v1682_v36 }
 0x988   :  { %1901 = vmatpush.msrb.mxu0 %v1157_v26  ;;  %v1158_v26 = vld [vmem:[#allocation12 + $0xf8] sm:$0xff] }
 0x989   :  { %1753 = vmatpush.msra.mxu2 %v1158_v26 }
 0x98b   :  { %1852 = vmatpush.msrb.mxu2 %v2969_v16 }
 0x98d   :  { %1479 = vmax.xlane.f32.xlu0 %v1478_v38 }
 0x98f   :  { %v1408_v39 = vpop.f32.mrf.mxu0 }
 0x990   :  { %v1472_v40 = vsel %vm151_vm1, -1e+09, %v1408_v39  ;;  %v1464_v28 = vpop.f32.mrf.mxu2 }
 0x991   :  { %v1474_v41 = vsel %vm151_vm1, -1e+09, %v1464_v28  ;;  %v1490_v34 = vsel %vm343_vm14, %v1472_v40, -inf }
 0x992   :  { %1491 = vmax.xlane.f32.xlu1 %v1490_v34  ;;  %v1496_v42 = vsel %vm343_vm14, %v1474_v41, -inf }
 0x995   :  { %1497 = vmax.xlane.f32.xlu0 %v1496_v42 }
 0x9a3   :  { %v1534_v43 = vpop.xlane.xlu0 %1533 }
 0x9a4   :  { %2391 = vrcp.f32 %v1534_v43 }
 0x9a9   :  { %v1656_v13 = vpop.f32.mrf.mxu2 }
 0x9aa   :  { %v2392_v44 = vpop.eup %2391 }
 0x9ab   :  { %v1558_v45 = vmul.f32 %v2392_v44, %v2388_v24 }
 0x9ad   :  { %2287 = vmatmul.msk.f32.vlgmr.msra.gmra.mxu0 %vm343_vm14, %v1558_v45 }
 0x9d1   :  { %v1610_v49 = vpop.f32.mrf.mxu0 }
 0x9d2   :  { %2280 = vmatmul.msk.f32.vlgmr.msrb.gmra.mxu1 %vm343_vm14, %v1610_v49 }
 0x9f8   :  { %v1495_v50 = vpop.xlane.xlu0 %1494 }
 0x9f9   :  { %v1505_v52 = vsub.f32 %v1473_v33, %v1495_v50 }
 0x9fb   :  { %v1519_v53 = vmul.f32 1.442695, %v1505_v52 }
 0x9fd   :  { %2393 = vpow2.f32 %v1519_v53 }
 0xa00   :  { %v1480_v54 = vpop.xlane.xlu0 %1479 }
 0xa01   :  { %v1500_v0 = vsub.f32 %v1468_v37, %v1480_v54  ;;  %v2323_v37 = vld [vmem:[#allocation13 + $0x7] ss:$0 sm:$0xff] }
 0xa03   :  { %v2394_v55 = vpop.eup %2393  ;;  %v1509_v56 = vmul.f32 1.442695, %v1500_v0 }
 0xa04   :  { %v1541_v57 = vsel %vm343_vm14, %v2394_v55, 0.0  ;;  %v1705_v15 = vpop.f32.mrf.mxu0 }
 0xa05   :  { %2395 = vpow2.f32 %v1509_v56  ;;  %1542 = vadd.xlane.f32.xlu2 %v1541_v57  ;;  %v1492_v63 = vpop.xlane.xlu1 %1491 }
 0xa06   :  { %v1504_v4 = vsub.f32 %v1472_v40, %v1492_v63  ;;  %v2081_v63 = vld [vmem:[#allocation12 + $0x120] sm:$0xff] }
 0xa08   :  { %v1498_v58 = vpop.xlane.xlu0 %1497  ;;  %v1517_v5 = vmul.f32 1.442695, %v1504_v4 }
 0xa09   :  { %v1506_v59 = vsub.f32 %v1474_v41, %v1498_v58 }
 0xa0b   :  { %v2396_v61 = vpop.eup %2395  ;;  %v1521_v62 = vmul.f32 1.442695, %v1506_v59  ;;  %v2046_v59 = vld [vmem:[#allocation12 + $0x118] sm:$0xff] }
 0xa0c   :  { %v1526_v1 = vsel %vm343_vm14, %v2396_v61, 0.0 }
 0xa0d   :  { %2397 = vpow2.f32 %v1521_v62  ;;  %1527 = vadd.xlane.f32.xlu0 %v1526_v1  ;;  %v2045_v62 = vld [vmem:[#allocation12 + $0x110] sm:$0xff] }
 0xa0e   :  { %2399 = vpow2.f32 %v1517_v5  ;;  %v2083_v1 = vld [vmem:[#allocation12 + $0x130] sm:$0xff] }
 0xa13   :  { %v2398_v3 = vpop.eup %2397 }
 0xa14   :  { %v1544_v47 = vsel %vm343_vm14, %v2398_v3, 0.0  ;;  %v2400_v7 = vpop.eup %2399 }
 0xa15   :  { %1545 = vadd.xlane.f32.xlu1 %v1544_v47  ;;  %v1538_v2 = vsel %vm343_vm14, %v2400_v7, 0.0  ;;  %v2082_v47 = vld [vmem:[#allocation12 + $0x128] sm:$0xff] }
 0xa1d   :  { %1857 = vrot.lane.b32.xlu2 %v2950_v60, %s2619_s11 }
 0xa21   :  { %1709 = vrot.lane.b32.xlu0 %v2924_v18, %s2621_s13 }
 0xa2a   :  { %v1808_v19 = vpop.f32.mrf.mxu0 }
 0xa2e   :  { %1907 = vrot.lane.b32.xlu1 %v2950_v60, %s2621_s13 }
 0xa4b   :  { %1539 = vadd.xlane.f32.xlu0 %v1538_v2 }
 0xa4f   :  { %v1633_v27 = vpop.f32.mrf.mxu1 }
 0xa50   :  { %v1657_v35 = vadd.f32 %v1656_v13, %v1633_v27 }
 0xa52   :  { %v1708_v36 = vadd.f32 %v1705_v15, %v1657_v35 }
 0xa78   :  { %v1543_v8 = vpop.xlane.xlu2 %1542 }
 0xa80   :  { %v1528_v9 = vpop.xlane.xlu0 %1527  ;;  %v1858_v11 = vpop.permute.xlu2 %1857 }
 0xa81   :  { %2401 = vrcp.f32 %v1528_v9  ;;  %1878 = vmatpush.msrb.mxu3 %v1858_v11 }
 0xa82   :  { %2403 = vrcp.f32 %v1543_v8 }
 0xa87   :  { %v2402_v6 = vpop.eup %2401 }
 0xa88   :  { %v1556_v12 = vmul.f32 %v2402_v6, %v2396_v61  ;;  %v2404_v18 = vpop.eup %2403  ;;  %v1546_v17 = vpop.xlane.xlu1 %1545  ;;  %v2084_v61 = vld [vmem:[#allocation12 + $0x138] sm:$0xff] }
 0xa89   :  { %v1561_v60 = vmul.f32 %v2404_v18, %v2394_v55  ;;  %2405 = vrcp.f32 %v1546_v17  ;;  %2099 = vmatpush.msra.mxu0 %v2084_v61 }
 0xa8a   :  { %2286 = vmatmul.msk.f32.vlgmr.msra.gmra.mxu3 %vm343_vm14, %v1556_v12 }
 0xa8b   :  { %2067 = vmatpush.msra.mxu3 %v2046_v59  ;;  %2100 = vmatpush.msra.mxu0 %v2083_v1  ;;  %v2150_v1 = vld [vmem:[#allocation12 + $0x168] sm:$0xff] }
 0xa8d   :  { %2068 = vmatpush.msra.mxu3 %v2045_v62  ;;  %2101 = vmatpush.msra.mxu0 %v2082_v47  ;;  %v2151_v62 = vld [vmem:[#allocation12 + $0x170] sm:$0xff]  ;;  %v2149_v47 = vld [vmem:[#allocation12 + $0x160] sm:$0xff] }
 0xa8f   :  { %v2406_v20 = vpop.eup %2405  ;;  %2102 = vmatpush.msra.mxu0 %v2081_v63  ;;  %v2114_v63 = vld [vmem:[#allocation12 + $0x148] sm:$0xff] }
 0xa90   :  { %v1562_v22 = vmul.f32 %v2406_v20, %v2398_v3  ;;  %v2044_v3 = vld [vmem:[#allocation12 + $0x108] sm:$0xff] }
 0xa91   :  { %2069 = vmatpush.msra.mxu3 %v2044_v3  ;;  %v2116_v3 = vld [vmem:[#allocation12 + $0x158] sm:$0xff] }
 0xa93   :  { %v1710_v14 = vpop.permute.xlu0 %1709 }
 0xa94   :  { %1730 = vmatpush.msra.mxu1 %v1710_v14 }
 0xa95   :  { %2284 = vmatmul.msk.f32.vlgmr.msra.gmra.mxu1 %vm343_vm14, %v1561_v60 }
 0xa96   :  { %1829 = vmatpush.msrb.mxu1 %v1156_v48 }
 0xa9d   :  { %2288 = vmatmul.msk.f32.vlgmr.msrb.gmra.mxu1 %vm343_vm14, %v1808_v19 }
 0xaa0   :  { %v1908_v21 = vpop.permute.xlu1 %1907 }
 0xaa1   :  { %1928 = vmatpush.msra.mxu1 %v1908_v21 }
 0xaa3   :  { %2135 = vmatpush.msrb.mxu1 %v2116_v3 }
 0xaa5   :  { %2292 = vmatmul.msk.f32.vlgmr.msra.gmra.mxu1 %vm343_vm14, %v1562_v22 }
 0xabe   :  { %v1540_v23 = vpop.xlane.xlu0 %1539 }
 0xabf   :  { %2407 = vrcp.f32 %v1540_v23 }
 0xac5   :  { %v2408_v24 = vpop.eup %2407 }
 0xac6   :  { %v1560_v25 = vmul.f32 %v2408_v24, %v2400_v7 }
 0xac8   :  { %2290 = vmatmul.msk.f32.vlgmr.msrb.gmra.mxu3 %vm343_vm14, %v1560_v25 }
 0xb0d   :  { %v1781_v30 = vpop.f32.mrf.mxu3 }
 0xb12   :  { %v1732_v29 = vpop.f32.mrf.mxu1 }
 0xb13   :  { %2285 = vmatmul.msk.f32.vlgmr.msra.gmra.mxu2 %vm343_vm14, %v1732_v29  ;;  %v2036_v29 = vstv %s3033_s4 }
 0xb14   :  { %1951 = vmatpush.msra.mxu2 %v1158_v26 }
 0xb1a   :  { %v1831_v31 = vpop.f32.mrf.mxu1 }
 0xb1b   :  { %2289 = vmatmul.msk.f32.vlgmr.msrb.gmra.mxu2 %vm343_vm14, %v1781_v30 }
 0xb22   :  { %v1930_v32 = vpop.f32.mrf.mxu1 }
 0xb23   :  { %2293 = vmatmul.msk.f32.vlgmr.msra.gmra.mxu2 %vm343_vm14, %v1930_v32 }
 0xb4b   :  { %v1880_v33 = vpop.f32.mrf.mxu3 }
 0xb4c   :  { %2291 = vmatmul.msk.f32.vlgmr.msrb.gmra.mxu0 %vm343_vm14, %v1880_v33 }
 0xb96   :  { %v1755_v16 = vpop.f32.mrf.mxu2 }
 0xb97   :  { %v1758_v38 = vadd.f32 %v1755_v16, %v1708_v36 }
 0xb99   :  { %v1760_v39 = vadd.f32 %v2323_v37, %v1758_v38 }
 0xb9b   :  { %v3014_v40 = vadd.f32 %v1760_v39, %v2849_v46 }
 0xb9d   :  { %v1960_v28 = vsel %vm152_vm0, %v3014_v40, 0.0 }
 0xb9e   :  { %1961 = vadd.xlane.f32.xlu2 %v1960_v28  ;;  %v1854_v41 = vpop.f32.mrf.mxu2  ;;  %v2152_v28 = vld [vmem:[#allocation12 + $0x178] sm:$0xff] }
 0xb9f   :  { %v1855_v34 = vadd.f32 %v1854_v41, %v1831_v31  ;;  %v2039_v31 = vstv %s3035_s15  ;;  %2171 = vmatpush.msrb.mxu2 %v2152_v28 }
 0xba1   :  { %2172 = vmatpush.msrb.mxu2 %v2151_v62 }
 0xba3   :  { %2173 = vmatpush.msrb.mxu2 %v2150_v1 }
 0xba5   :  { %2174 = vmatpush.msrb.mxu2 %v2149_v47 }
 0xba6   :  { %v1953_v44 = vpop.f32.mrf.mxu2 }
 0xbc9   :  { %v1903_v42 = vpop.f32.mrf.mxu0 }
 0xbca   :  { %v1906_v43 = vadd.f32 %v1903_v42, %v1855_v34 }
 0xbcc   :  { %v1956_v45 = vadd.f32 %v1953_v44, %v1906_v43 }
 0xbce   :  { %v1957_v48 = vadd.f32 %v2323_v37, %v1956_v45 }
 0xbd0   :  { %v3019_v49 = vadd.f32 %v1957_v48, %v2864_v51 }
 0xbd2   :  { %v1963_v50 = vsel %vm152_vm0, %v3019_v49, 0.0 }
 0xbd3   :  { %1964 = vadd.xlane.f32.xlu1 %v1963_v50 }
 0xc11   :  { %v1962_v46 = vpop.xlane.xlu2 %1961 }
 0xc12   :  { %v1966_v52 = vmul.f32 %v1962_v46, %v2710_v10 }
 0xc14   :  { %v1968_v53 = vsub.f32 %v3014_v40, %v1966_v52 }
 0xc16   :  { %v1970_v54 = vmul.f32 %v1968_v53, %v1968_v53 }
 0xc18   :  { %v1972_v0 = vsel %vm152_vm0, %v1970_v54, 0.0 }
 0xc19   :  { %1973 = vadd.xlane.f32.xlu0 %v1972_v0 }
 0xc46   :  { %v1965_v55 = vpop.xlane.xlu1 %1964 }
 0xc47   :  { %v1967_v56 = vmul.f32 %v1965_v55, %v2710_v10  ;;  %v2043_v10 = vld [vmem:[#allocation12 + $0x100] sm:$0xff] }
 0xc48   :  { %2070 = vmatpush.msra.mxu3 %v2043_v10  ;;  %v2115_v10 = vld [vmem:[#allocation12 + $0x150] sm:$0xff] }
 0xc49   :  { %v3028_v57 = vsub.f32 %v3019_v49, %v1967_v56  ;;  %2136 = vmatpush.msrb.mxu1 %v2115_v10 }
 0xc4b   :  { %v1971_v51 = vmul.f32 %v3028_v57, %v3028_v57  ;;  %2137 = vmatpush.msrb.mxu1 %v2114_v63 }
 0xc4d   :  { %v1975_v58 = vsel %vm152_vm0, %v1971_v51, 0.0 }
 0xc4e   :  { %1976 = vadd.xlane.f32.xlu0 %v1975_v58 }
 0xc8c   :  { %v1974_v4 = vpop.xlane.xlu0 %1973 }
 0xc8d   :  { %v1978_v5 = vmul.f32 0.032258064, %v1974_v4  ;;  %v2113_v4 = vld [vmem:[#allocation12 + $0x140] sm:$0xff] }
 0xc8e   :  { %2138 = vmatpush.msrb.mxu1 %v2113_v4 }
 0xc8f   :  { %2409 = vrsqrt.f32 %v1978_v5  ;;  %vm1987_vm14 = vcmp.eq.f32.partialorder %v1978_v5, inf  ;;  %v1990_v18 = vand.u32 2147483648, %v1978_v5  ;;  %vm1989_vm2 = vcmp.eq.f32.partialorder %v1978_v5, 0.0 }
 0xc95   :  { %v2410_v7 = vpop.eup %2409 }
 0xc96   :  { %v1981_v2 = vmul.f32 %v2410_v7, %v1978_v5 }
 0xc98   :  { %v1982_v8 = vmul.f32 %v2410_v7, %v1981_v2 }
 0xc9a   :  { %v1983_v9 = vmul.f32 0.5, %v1982_v8  ;;  %v2325_v8 = vld [vmem:[#allocation13 + $0x8] ss:$0 sm:$0xff] }
 0xc9c   :  { %v1984_v11 = vsub.f32 1.5, %v1983_v9 }
 0xc9e   :  { %v1985_v6 = vmul.f32 %v2410_v7, %v1984_v11 }
 0xca0   :  { %v1986_v12 = vmul.f32 %v1985_v6, %v1978_v5 }
 0xca2   :  { %v1988_v60 = vsel %vm1987_vm14, %v1978_v5, %v1986_v12 }
 0xca3   :  { %v1991_v14 = vsel %vm1989_vm2, %v1990_v18, %v1988_v60 }
 0xca4   :  { %v2004_v15 = vadd.f32 1e-06, %v1991_v14 }
 0xca6   :  { %2411 = vrcp.f32 %v2004_v15  ;;  %v2017_v21 = vand.u32 2147483648, %v2004_v15  ;;  %v2015_v23 = vand.u32 2147483647, %v2004_v15  ;;  %vm2011_vm4 = vweird.f32 %v2004_v15 }
 0xca8   :  { %v2018_v25 = vor.u32 1.1754944e-38, %v2017_v21  ;;  %vm2016_vm6 = vcmp.eq.f32.partialorder %v2015_v23, 8.507059e+37  ;;  %v2326_v21 = vld [vmem:[#allocation13 + $0xa] ss:$0 sm:$0xff] }
 0xcac   :  { %v2412_v17 = vpop.eup %2411 }
 0xcad   :  { %v2007_v19 = vmul.f32 %v2412_v17, %v2004_v15  ;;  %vm2012_vm3 = vweird.f32 %v2412_v17 }
 0xcae   :  { %vm2013_vm5 = vmor %vm2011_vm4, %vm2012_vm3 }
 0xcaf   :  { %v2008_v20 = vsub.f32 1.0, %v2007_v19 }
 0xcb1   :  { %v2009_v22 = vmul.f32 %v2412_v17, %v2008_v20 }
 0xcb3   :  { %v2010_v24 = vadd.f32 %v2412_v17, %v2009_v22 }
 0xcb5   :  { %v2014_v26 = vsel %vm2013_vm5, %v2412_v17, %v2010_v24 }
 0xcb6   :  { %v2019_v27 = vsel %vm2016_vm6, %v2018_v25, %v2014_v26 }
 0xcb7   :  { %v2020_v30 = vmul.f32 %v2019_v27, %v1968_v53 }
 0xcb9   :  { %v2037_v32 = vmul.f32 %v2036_v29, %v2020_v30 }
 0xcbb   :  { %v2040_v33 = vadd.f32 %v2039_v31, %v2037_v32 }
 0xcbd   :  { %2294 = vmatmul.msk.f32.vlgmr.msra.gmra.mxu3 %vm152_vm0, %v2040_v33  ;;  %2296 = vmatmul.msk.f32.vlgmr.msra.gmra.mxu0 %vm152_vm0, %v2040_v33 }
 0xcc1   :  { %v1977_v13 = vpop.xlane.xlu0 %1976 }
 0xcc2   :  { %v1979_v35 = vmul.f32 0.032258064, %v1977_v13 }
 0xcc4   :  { %2413 = vrsqrt.f32 %v1979_v35  ;;  %vm1999_vm7 = vcmp.eq.f32.partialorder %v1979_v35, inf  ;;  %v2002_v42 = vand.u32 2147483648, %v1979_v35  ;;  %vm2001_vm8 = vcmp.eq.f32.partialorder %v1979_v35, 0.0 }
 0xcca   :  { %v2414_v36 = vpop.eup %2413 }
 0xccb   :  { %v1993_v37 = vmul.f32 %v2414_v36, %v1979_v35 }
 0xccd   :  { %v1994_v16 = vmul.f32 %v2414_v36, %v1993_v37 }
 0xccf   :  { %v1995_v38 = vmul.f32 0.5, %v1994_v16 }
 0xcd1   :  { %v1996_v39 = vsub.f32 1.5, %v1995_v38 }
 0xcd3   :  { %v1997_v41 = vmul.f32 %v2414_v36, %v1996_v39 }
 0xcd5   :  { %v1998_v34 = vmul.f32 %v1997_v41, %v1979_v35 }
 0xcd7   :  { %v2000_v43 = vsel %vm1999_vm7, %v1979_v35, %v1998_v34 }
 0xcd8   :  { %v2003_v44 = vsel %vm2001_vm8, %v2002_v42, %v2000_v43 }
 0xcd9   :  { %v2005_v45 = vadd.f32 1e-06, %v2003_v44 }
 0xcdb   :  { %2415 = vrcp.f32 %v2005_v45  ;;  %v2032_v52 = vand.u32 2147483648, %v2005_v45  ;;  %v2030_v54 = vand.u32 2147483647, %v2005_v45  ;;  %vm2026_vm10 = vweird.f32 %v2005_v45 }
 0xcdd   :  { %v2033_v55 = vor.u32 1.1754944e-38, %v2032_v52  ;;  %vm2031_vm12 = vcmp.eq.f32.partialorder %v2030_v54, 8.507059e+37 }
 0xce1   :  { %v2416_v48 = vpop.eup %2415 }
 0xce2   :  { %v2022_v50 = vmul.f32 %v2416_v48, %v2005_v45  ;;  %vm2027_vm9 = vweird.f32 %v2416_v48 }
 0xce3   :  { %vm2028_vm11 = vmor %vm2026_vm10, %vm2027_vm9 }
 0xce4   :  { %v2023_v46 = vsub.f32 1.0, %v2022_v50 }
 0xce6   :  { %v2024_v53 = vmul.f32 %v2416_v48, %v2023_v46 }
 0xce8   :  { %v2025_v0 = vadd.f32 %v2416_v48, %v2024_v53 }
 0xcea   :  { %v2029_v56 = vsel %vm2028_vm11, %v2416_v48, %v2025_v0 }
 0xceb   :  { %v2034_v51 = vsel %vm2031_vm12, %v2033_v55, %v2029_v56 }
 0xcec   :  { %v2035_v58 = vmul.f32 %v2034_v51, %v3028_v57  ;;  %v2324_v57 = vld [vmem:[#allocation13 + $0x9] ss:$0 sm:$0xff] }
 0xcee   :  { %v2038_v59 = vmul.f32 %v2036_v29, %v2035_v58 }
 0xcf0   :  { %v2041_v61 = vadd.f32 %v2039_v31, %v2038_v59 }
 0xcf2   :  { %2295 = vmatmul.msk.f32.gmra.mxu3 %vm152_vm0, %v2041_v61  ;;  %2297 = vmatmul.msk.f32.gmra.mxu0 %vm152_vm0, %v2041_v61 }
 0xd3a   :  { %v2104_v5 = vpop.f32.mrf.mxu0 }
 0xd3b   :  { %v2105_v7 = vadd.f32 %v2324_v57, %v2104_v5 }
 0xd3d   :  { %v2110_v2 = vmax.f32 %v2105_v7, 0.0 }
 0xd3f   :  { %2300 = vmatmul.msk.f32.vlgmr.msrb.gmra.mxu2 %vm152_vm0, %v2110_v2 }
 0xd40   :  { %v2072_v9 = vpop.f32.mrf.mxu3 }
 0xd41   :  { %v2073_v11 = vadd.f32 %v2325_v8, %v2072_v9 }
 0xd43   :  { %v2078_v6 = vmax.f32 %v2073_v11, 0.0 }
 0xd45   :  { %2298 = vmatmul.msk.f32.vlgmr.msrb.gmra.mxu1 %vm152_vm0, %v2078_v6 }
 0xd6f   :  { %v2107_v12 = vpop.f32.mrf.mxu0 }
 0xd70   :  { %v2108_v18 = vadd.f32 %v2324_v57, %v2107_v12 }
 0xd72   :  { %v2111_v60 = vmax.f32 %v2108_v18, 0.0 }
 0xd74   :  { %2301 = vmatmul.msk.f32.gmra.mxu2 %vm152_vm0, %v2111_v60 }
 0xd75   :  { %v2075_v14 = vpop.f32.mrf.mxu3 }
 0xd76   :  { %v2076_v15 = vadd.f32 %v2325_v8, %v2075_v14 }
 0xd78   :  { %v2079_v17 = vmax.f32 %v2076_v15, 0.0 }
 0xd7a   :  { %2299 = vmatmul.msk.f32.gmra.mxu1 %vm152_vm0, %v2079_v17 }
 0xdc2   :  { %v2140_v19 = vpop.f32.mrf.mxu1  ;;  %v2176_v22 = vpop.f32.mrf.mxu2 }
 0xdc3   :  { %v2146_v20 = vadd.f32 %v2140_v19, %v3014_v40 }
 0xdc5   :  { %v2182_v23 = vadd.f32 %v2176_v22, %v2146_v20 }
 0xdc7   :  { %v2186_v24 = vadd.f32 %v2326_v21, %v2182_v23 }
 0xdc9   :  { %2188 = vst.msk [vmem:[#allocation15] sm:$0xff] %vm152_vm0, %v2186_v24 }
 0xdf7   :  { %v2143_v25 = vpop.f32.mrf.mxu1  ;;  %v2179_v27 = vpop.f32.mrf.mxu2 }
 0xdf8   :  { %v2147_v26 = vadd.f32 %v2143_v25, %v3019_v49 }
 0xdfa   :  { %v2183_v29 = vadd.f32 %v2179_v27, %v2147_v26 }
 0xdfc   :  { %v2187_v30 = vadd.f32 %v2326_v21, %v2183_v29 }
 0xdfe   :  { %2189 = vst.msk [vmem:[#allocation15 + $0x8] sm:$0xff] %vm152_vm0, %v2187_v30 }
 0xdff   :  { %2202 = dma.vmem_to_hbm [thread:$0]  %s2195_s17, 256, %s2197_s20, [#allocation4], %s2610_s9, %s2610_s9, %s2611_s10  }
 0xe00   :  { %2607 = dma.done.wait [#allocation4], 256  }
 0xe01   :  { %2608 = vsyncadd [#allocation4], 4294967040 }
 0xe02   :  { %2207 = vsyncpa [#allocation3], 1 }
 0xe03   :  { %2208 = vsyncpa [#allocation8], 1 }
 0xe04   :  { %2209 = vsyncpa [#allocation11], 1 }
 0xe05   :  { %2210 = vsyncpa [#allocation14], 1 }
 0xe06   :  { %2211 = vsyncpa [#allocation4], 1 }
 0xe07   :  { %2212 = vsyncpa [#allocation5], 1 }

</bundles_post_ra>
